<compile_context>
chip_gen: v7x
topology: tpu7x:2x2x1
jax: 0.10.0
libtpu: 0.0.40
codegen_flags: <defaults>
</compile_context>

<pallas_src>
import math

import jax
import jax.numpy as jnp
from jax.experimental import pallas as pl
from jax.experimental.pallas import tpu as pltpu

MAX_DIFF_RES = 128
_LANE = 128
_SUBLANE = 8
_NODE_PAD = 16          # multiple of 16 sublanes -> clean bf16 packing


def _round_up(v, m):
    return ((v + m - 1) // m) * m


# ------------------------------ fused Pallas kernel ------------------------------ #

def _make_fused_kernel(num_layers, has_skip):
    """Fused ResGraphConvolution forward for a (Bb, Np, *) batch block.

    Ref layout (feature dims pre-padded to multiples of 128, nodes to multiples of 16):
      x_ref    (Bb, Np, F0p)  bf16 if has_skip else f32
      adj_ref  (Bb, Np, Np)   bf16 (pre-cast in HBM)
      mask_ref (Bb, Np, 1)    f32
      per layer i: w_i (Fi_p, Fi1_p) bf16, b_i (1, Fi1_p) f32
      if has_skip: skip_wt (F0p, Hp) bf16, skip_b (1, Hp) f32
      o_ref    (Bb, Np, Hp)   f32
    """
    assert num_layers >= 1
    n_params = 2 * num_layers + (2 if has_skip else 0)

    def kernel(x_ref, adj_ref, mask_ref, *refs):
        params = refs[:n_params]
        o_ref = refs[n_params]

        Bb, Np, F0p = x_ref.shape
        Hp = o_ref.shape[-1]

        x = x_ref[...].reshape(Bb * Np, F0p)       # flattened slab for h@W / skip matmuls
        adj = adj_ref[...]                          # (Bb, Np, Np) bf16, resident across layers
        m = mask_ref[...].reshape(Bb * Np, 1)       # (Bb*Np, 1) f32

        # Hoist the mask broadcast: one broadcast per distinct padded width, reused.
        bmask = {}

        def mask_for(width):
            if width not in bmask:
                bmask[width] = jnp.broadcast_to(m, (Bb * Np, width))
            return bmask[width]

        # x is already bf16 when has_skip (pre-cast in HBM); otherwise cast once here.
        x_bf = x if x.dtype == jnp.bfloat16 else x.astype(jnp.bfloat16)

        h = x_bf                                    # bf16 MXU operand
        h_f32 = None
        for i in range(num_layers):                 # static Python loop (unrolled trace)
            w = params[2 * i][...]                  # (Fin_p, Fout_p) bf16
            b = params[2 * i + 1][...]              # (1, Fout_p) f32
            fout = w.shape[1]
            support = jnp.dot(h, w, preferred_element_type=jnp.float32)      # (Bb*Np, Fout_p)
            support = support.astype(jnp.bfloat16).reshape(Bb, Np, fout)
            agg = jnp.einsum("bij,bjf->bif", adj, support,
                             preferred_element_type=jnp.float32)             # adj @ support
            out = agg.reshape(Bb * Np, fout) + b
            h_f32 = jnp.maximum(out, 0.0) * mask_for(fout)                   # ReLU then mask (f32)
            if i + 1 < num_layers:
                h = h_f32.astype(jnp.bfloat16)      # next layer consumes bf16 on the MXU

        if has_skip:
            wt = params[2 * num_layers][...]        # (F0p, Hp) bf16
            sb = params[2 * num_layers + 1][...]    # (1, Hp) f32
            res = jnp.dot(x_bf, wt, preferred_element_type=jnp.float32) + sb
        else:
            res = x                                 # f32 identity residual

        o_ref[...] = ((h_f32 + res) * mask_for(Hp)).reshape(Bb, Np, Hp).astype(o_ref.dtype)

    return kernel


def fused_res_gcn(x_p, adj_p, mask_p, layer_params, skip_params):
    """One pallas_call over the batch; each grid step does all layers + residual for Bb elems."""
    B, Np, F0p = x_p.shape
    num_layers = len(layer_params)
    has_skip = skip_params is not None
    Hp = layer_params[-1][0].shape[1]

    params = []
    for (w, b) in layer_params:
        params += [w, b]
    if has_skip:
        params += list(skip_params)

    # ----------------------- VMEM budget / batch-block selection ----------------------- #
    cap = 128 << 20                                   # v5e/v6e per-core VMEM; v7x is 64 MiB
    try:
        cap = int(getattr(pltpu.get_tpu_info(), "vmem_capacity_bytes", cap))
    except Exception:
        pass
    budget = int(0.75 * cap)

    per_elem_io = Np * (F0p * x_p.dtype.itemsize
                        + Np * adj_p.dtype.itemsize
                        + mask_p.dtype.itemsize
                        + Hp * 4)                     # x + adj + mask + out, one batch element
    fmax = max([F0p, Hp] + [w.shape[1] for (w, _) in layer_params])
    param_bytes = sum(int(p.size) * p.dtype.itemsize for p in params)

    def vmem_estimate(bb):
        # double-buffered I/O blocks + weights + f32 compute temporaries
        return 2 * bb * per_elem_io + 2 * param_bytes + 6 * bb * Np * fmax * 4

    Bb = 1
    for bb in range(1, B + 1):
        if B % bb or bb > 8:
            continue
        if B >= 2 and B // bb < 2:
            continue                                  # keep >=2 grid steps -> both v7x TCs busy
        if vmem_estimate(bb) > budget:
            continue
        Bb = bb
    vmem_limit = int(min(max(2 * vmem_estimate(Bb), 32 << 20), budget))

    kernel = _make_fused_kernel(num_layers, has_skip)

    # TODO(synk): for very large N (N^2 bf16 adj no longer fitting the VMEM budget above,
    # ~a few thousand nodes on v7x's 64 MiB) the adjacency should additionally be
    # row-tiled with matching output row tiles; the graphs this module sees are small.
    def build(single_buffer_params):
        data_specs = [
            pl.BlockSpec((Bb, Np, F0p), lambda i: (i, 0, 0)),
            pl.BlockSpec((Bb, Np, Np), lambda i: (i, 0, 0)),
            # NOTE: for large Np the mask should be passed lane-dense; negligible here.
            pl.BlockSpec((Bb, Np, 1), lambda i: (i, 0, 0)),
        ]

        def const_spec(shape):
            idx = lambda i, _n=len(shape): (0,) * _n
            if single_buffer_params:
                # Grid-invariant weight/bias blocks only need one VMEM buffer.
                return pl.BlockSpec(shape, idx, pipeline_mode=pl.Buffered(1))
            return pl.BlockSpec(shape, idx)

        param_specs = [const_spec(p.shape) for p in params]
        return pl.pallas_call(
            kernel,
            out_shape=jax.ShapeDtypeStruct((B, Np, Hp), jnp.float32),
            grid=(B // Bb,),
            in_specs=data_specs + param_specs,
            out_specs=pl.BlockSpec((Bb, Np, Hp), lambda i: (i, 0, 0)),
            compiler_params=pltpu.CompilerParams(
                dimension_semantics=("parallel",),
                vmem_limit_bytes=vmem_limit),
        )

    args = [x_p, adj_p, mask_p] + params
    try:
        return build(single_buffer_params=True)(*args)
    except Exception:
        # Graceful fallback if this Mosaic build rejects pipeline_mode on top-level specs.
        return build(single_buffer_params=False)(*args)


# --------------------------------- module wrapper -------------------------------- #

class ResGraphConvolutionPallas:
    """JAX/Pallas re-implementation of ResGraphConvolution (gc_ln=False, dropout=0)."""

    # TODO(synk): gc_ln=True path (global-mean/std LayerNormalization) not implemented;
    # the module's default is gc_ln=False. Dropout is identity in eval mode.

    def __init__(self, input_dim, hidden_dim, bias=True, num_layers=3, key=None):
        assert bias, "bias=True is the only configuration exercised here"
        self.num_layers = num_layers
        self.hidden_dim = hidden_dim
        self.input_dim = input_dim
        self.pad_input_dim = _round_up(input_dim, _LANE)

        if key is None:
            key = jax.random.PRNGKey(0)

        # Replicate the layer-dimension schedule from the PyTorch __init__.
        features_dim = input_dim
        layer_diff = features_dim - hidden_dim
        is_dim_increase = False
        if layer_diff > 0 and layer_diff > MAX_DIFF_RES:
            layer_diff = MAX_DIFF_RES
        elif layer_diff < 0 and layer_diff < -MAX_DIFF_RES:
            layer_diff = -MAX_DIFF_RES
            is_dim_increase = True
        layer_dim = features_dim - layer_diff

        self.layers = []          # unpadded f32 (W (in,out), b (out,)) for the reference
        self.padded_layers = []   # zero-padded (W bf16 (in_p,out_p), b f32 (1,out_p)) for kernel
        for i in range(num_layers):
            if ((not is_dim_increase and layer_dim < hidden_dim)
                    or (is_dim_increase and layer_dim > hidden_dim)
                    or i == num_layers - 1):
                layer_dim = hidden_dim
            key, kw, kb = jax.random.split(key, 3)
            stdv = 1.0 / math.sqrt(layer_dim)
            w = jax.random.uniform(kw, (features_dim, layer_dim), jnp.float32,
                                   minval=-stdv, maxval=stdv)
            b = jax.random.uniform(kb, (layer_dim,), jnp.float32,
                                   minval=-stdv, maxval=stdv)
            self.layers.append((w, b))

            fin_p = _round_up(features_dim, _LANE)
            fout_p = _round_up(layer_dim, _LANE)
            # Pre-cast W to bf16 in HBM (MXU operand); keep bias f32 (added post-accumulate).
            w_p = jnp.zeros((fin_p, fout_p), jnp.bfloat16).at[:features_dim, :layer_dim].set(
                w.astype(jnp.bfloat16))
            b_p = jnp.zeros((1, fout_p), jnp.float32).at[0, :layer_dim].set(b)
            self.padded_layers.append((w_p, b_p))

            features_dim = layer_dim
            layer_dim -= layer_diff

        if input_dim != hidden_dim:
            # nn.Linear with kaiming_normal weight init, zero bias; stored pre-transposed.
            key, kw = jax.random.split(key)
            fan_in = input_dim
            w = jax.random.normal(kw, (hidden_dim, input_dim), jnp.float32) * math.sqrt(2.0 / fan_in)
            self.skip_wt = w.T                                  # (input_dim, hidden_dim) f32
            self.skip_b = jnp.zeros((hidden_dim,), jnp.float32)
            hp = _round_up(hidden_dim, _LANE)
            wt_p = jnp.zeros((self.pad_input_dim, hp), jnp.bfloat16)
            wt_p = wt_p.at[:input_dim, :hidden_dim].set(self.skip_wt.astype(jnp.bfloat16))
            sb_p = jnp.zeros((1, hp), jnp.float32)
            self.padded_skip = (wt_p, sb_p)
        else:
            self.skip_wt = None
            self.skip_b = None
            self.padded_skip = None

    def __call__(self, x, adj, mask=None):
        B, N, Fin = x.shape
        Np = _round_up(max(N, _SUBLANE), _NODE_PAD)
        F0p = self.pad_input_dim

        # Pre-cast the big MXU operands to bf16 already in HBM (halves DMA bytes, no
        # in-kernel casts). x stays f32 when there is no skip Linear, because the raw
        # input then feeds the residual addition directly.
        x_dtype = jnp.bfloat16 if self.padded_skip is not None else jnp.float32
        x_p = jnp.zeros((B, Np, F0p), x_dtype).at[:, :N, :Fin].set(x.astype(x_dtype))
        adj_p = jnp.zeros((B, Np, Np), jnp.bfloat16).at[:, :N, :N].set(adj.astype(jnp.bfloat16))
        if mask is None:
            mask_p = jnp.zeros((B, Np, 1), jnp.float32).at[:, :N, :].set(1.0)
        else:
            mask_p = jnp.zeros((B, Np, 1), jnp.float32).at[:, :N, 0].set(
                mask.astype(jnp.float32))

        out_p = fused_res_gcn(x_p, adj_p, mask_p, self.padded_layers, self.padded_skip)
        return out_p[:, :N, :self.hidden_dim]


# ----------------------------- reference (pure JAX, f32) ----------------------------- #

def reference_forward(model, x, adj, mask=None):
    h = x
    for (w, b) in model.layers:
        support = h @ w
        h = jnp.einsum("bij,bjf->bif", adj, support) + b
        h = jax.nn.relu(h)
        if mask is not None:
            h = h * mask.astype(jnp.float32)[:, :, None]
    if model.skip_wt is not None:
        h = h + x @ model.skip_wt + model.skip_b
    else:
        h = h + x
    if mask is not None:
        h = h * mask.astype(jnp.float32)[:, :, None]
    return h


# ----------------------------------------- main --------------------------------------- #

if __name__ == "__main__":
    key = jax.random.PRNGKey(0)
    k_param, k_x, k_adj = jax.random.split(key, 3)

    batch, node_num = 2, 8
    input_dim, hidden_dim = 48, 32

    model = ResGraphConvolutionPallas(input_dim, hidden_dim, bias=True,
                                      num_layers=3, key=k_param)

    x = jax.random.normal(k_x, (batch, node_num, input_dim), jnp.float32)
    adj_raw = jax.random.uniform(k_adj, (batch, node_num, node_num), jnp.float32)
    adj = adj_raw / jnp.sum(adj_raw, axis=-1, keepdims=True)  # row-normalized adjacency
    mask = jnp.ones((batch, node_num), jnp.float32).at[:, -2:].set(0.0)

    out = model(x, adj, mask)
    out = jax.block_until_ready(out)

    ref = reference_forward(model, x, adj, mask)
    assert out.shape == (batch, node_num, hidden_dim)
    # bf16 MXU operands with f32 accumulation -> compare against the f32 reference
    # with a tolerance covering bf16 rounding of the operands across 3 layers + skip.
    assert jnp.allclose(out, ref, atol=5e-2, rtol=5e-2), "mismatch vs pure-JAX reference"

    print("KERNEL_OK")
</pallas_src>

<mosaic_0001>
module attributes {stable_mosaic.version = 11 : i64} {
  func.func @kernel(%arg0: i32, %arg1: memref<1x16x128xbf16, #tpu.memory_space<vmem>>, %arg2: memref<1x16x16xbf16, #tpu.memory_space<vmem>>, %arg3: memref<1x16x1xf32, #tpu.memory_space<vmem>>, %arg4: memref<128x128xbf16, #tpu.memory_space<vmem>>, %arg5: memref<1x128xf32, #tpu.memory_space<vmem>>, %arg6: memref<128x128xbf16, #tpu.memory_space<vmem>>, %arg7: memref<1x128xf32, #tpu.memory_space<vmem>>, %arg8: memref<128x128xbf16, #tpu.memory_space<vmem>>, %arg9: memref<1x128xf32, #tpu.memory_space<vmem>>, %arg10: memref<128x128xbf16, #tpu.memory_space<vmem>>, %arg11: memref<1x128xf32, #tpu.memory_space<vmem>>, %arg12: memref<1x16x128xf32, #tpu.memory_space<vmem>>) attributes {dimension_semantics = [#tpu.dimension_semantics<parallel>], iteration_bounds = array<i64: 2>, scalar_prefetch = 0 : i64, scratch_operands = 0 : i64, tpu.core_type = #tpu.core_type<tc>, window_params = [{transform_indices = @transform_0, window_bounds = array<i64: 1, 16, 128>}, {transform_indices = @transform_1, window_bounds = array<i64: 1, 16, 16>}, {transform_indices = @transform_2, window_bounds = array<i64: 1, 16, 1>}, {pipeline_mode = #tpu.pipeline_mode<synchronous>, transform_indices = @transform_3, window_bounds = array<i64: 128, 128>}, {pipeline_mode = #tpu.pipeline_mode<synchronous>, transform_indices = @transform_4, window_bounds = array<i64: 1, 128>}, {pipeline_mode = #tpu.pipeline_mode<synchronous>, transform_indices = @transform_5, window_bounds = array<i64: 128, 128>}, {pipeline_mode = #tpu.pipeline_mode<synchronous>, transform_indices = @transform_6, window_bounds = array<i64: 1, 128>}, {pipeline_mode = #tpu.pipeline_mode<synchronous>, transform_indices = @transform_7, window_bounds = array<i64: 128, 128>}, {pipeline_mode = #tpu.pipeline_mode<synchronous>, transform_indices = @transform_8, window_bounds = array<i64: 1, 128>}, {pipeline_mode = #tpu.pipeline_mode<synchronous>, transform_indices = @transform_9, window_bounds = array<i64: 128, 128>}, {pipeline_mode = #tpu.pipeline_mode<synchronous>, transform_indices = @transform_10, window_bounds = array<i64: 1, 128>}, {transform_indices = @transform_11, window_bounds = array<i64: 1, 16, 128>}]} {
    %c0 = arith.constant 0 : index
    %c0_0 = arith.constant 0 : index
    %c0_1 = arith.constant 0 : index
    %0 = vector.load %arg1[%c0, %c0_0, %c0_1] : memref<1x16x128xbf16, #tpu.memory_space<vmem>>, vector<1x16x128xbf16>
    %1 = vector.shape_cast %0 : vector<1x16x128xbf16> to vector<16x128xbf16>
    %c0_2 = arith.constant 0 : index
    %c0_3 = arith.constant 0 : index
    %c0_4 = arith.constant 0 : index
    %2 = vector.load %arg2[%c0_2, %c0_3, %c0_4] : memref<1x16x16xbf16, #tpu.memory_space<vmem>>, vector<1x16x16xbf16>
    %c0_5 = arith.constant 0 : index
    %c0_6 = arith.constant 0 : index
    %c0_7 = arith.constant 0 : index
    %3 = vector.load %arg3[%c0_5, %c0_6, %c0_7] : memref<1x16x1xf32, #tpu.memory_space<vmem>>, vector<1x16x1xf32>
    %4 = vector.shape_cast %3 : vector<1x16x1xf32> to vector<16x1xf32>
    %c0_8 = arith.constant 0 : index
    %c0_9 = arith.constant 0 : index
    %5 = vector.load %arg4[%c0_8, %c0_9] : memref<128x128xbf16, #tpu.memory_space<vmem>>, vector<128x128xbf16>
    %c0_10 = arith.constant 0 : index
    %c0_11 = arith.constant 0 : index
    %6 = vector.load %arg5[%c0_10, %c0_11] : memref<1x128xf32, #tpu.memory_space<vmem>>, vector<1x128xf32>
    %cst = arith.constant dense<0.000000e+00> : vector<16x128xf32>
    %7 = tpu.matmul %1, %5, %cst {dimension_numbers = #tpu.dot_dimension_numbers<[1], [0], [0], [1], [0, 0, 1, 1], [], []>} : vector<16x128xbf16>, vector<128x128xbf16>, vector<16x128xf32> -> vector<16x128xf32>
    %8 = arith.truncf %7 : vector<16x128xf32> to vector<16x128xbf16>
    %9 = vector.shape_cast %8 : vector<16x128xbf16> to vector<1x16x128xbf16>
    "tpu.trace_start"() <{level = 10 : i32, message = "bij,bjf->bif"}> : () -> ()
    %cst_12 = arith.constant dense<0.000000e+00> : vector<1x16x128xf32>
    %10 = tpu.matmul %2, %9, %cst_12 {dimension_numbers = #tpu.dot_dimension_numbers<[2], [1], [1], [2], [0, 0, 0, 1, 1, 2], [0], [0]>} : vector<1x16x16xbf16>, vector<1x16x128xbf16>, vector<1x16x128xf32> -> vector<1x16x128xf32>
    "tpu.trace_stop"() : () -> ()
    %11 = vector.shape_cast %10 : vector<1x16x128xf32> to vector<16x128xf32>
    %12 = vector.broadcast %6 : vector<1x128xf32> to vector<16x128xf32>
    %13 = arith.addf %11, %12 : vector<16x128xf32>
    %cst_13 = arith.constant 0.000000e+00 : f32
    %14 = vector.broadcast %cst_13 : f32 to vector<16x128xf32>
    %15 = arith.maximumf %13, %14 : vector<16x128xf32>
    %16 = vector.shape_cast %4 : vector<16x1xf32> to vector<16x1xf32>
    %17 = vector.broadcast %16 : vector<16x1xf32> to vector<16x128xf32>
    %18 = arith.mulf %15, %17 : vector<16x128xf32>
    %19 = arith.truncf %18 : vector<16x128xf32> to vector<16x128xbf16>
    %c0_14 = arith.constant 0 : index
    %c0_15 = arith.constant 0 : index
    %20 = vector.load %arg6[%c0_14, %c0_15] : memref<128x128xbf16, #tpu.memory_space<vmem>>, vector<128x128xbf16>
    %c0_16 = arith.constant 0 : index
    %c0_17 = arith.constant 0 : index
    %21 = vector.load %arg7[%c0_16, %c0_17] : memref<1x128xf32, #tpu.memory_space<vmem>>, vector<1x128xf32>
    %cst_18 = arith.constant dense<0.000000e+00> : vector<16x128xf32>
    %22 = tpu.matmul %19, %20, %cst_18 {dimension_numbers = #tpu.dot_dimension_numbers<[1], [0], [0], [1], [0, 0, 1, 1], [], []>} : vector<16x128xbf16>, vector<128x128xbf16>, vector<16x128xf32> -> vector<16x128xf32>
    %23 = arith.truncf %22 : vector<16x128xf32> to vector<16x128xbf16>
    %24 = vector.shape_cast %23 : vector<16x128xbf16> to vector<1x16x128xbf16>
    "tpu.trace_start"() <{level = 10 : i32, message = "bij,bjf->bif"}> : () -> ()
    %cst_19 = arith.constant dense<0.000000e+00> : vector<1x16x128xf32>
    %25 = tpu.matmul %2, %24, %cst_19 {dimension_numbers = #tpu.dot_dimension_numbers<[2], [1], [1], [2], [0, 0, 0, 1, 1, 2], [0], [0]>} : vector<1x16x16xbf16>, vector<1x16x128xbf16>, vector<1x16x128xf32> -> vector<1x16x128xf32>
    "tpu.trace_stop"() : () -> ()
    %26 = vector.shape_cast %25 : vector<1x16x128xf32> to vector<16x128xf32>
    %27 = vector.broadcast %21 : vector<1x128xf32> to vector<16x128xf32>
    %28 = arith.addf %26, %27 : vector<16x128xf32>
    %cst_20 = arith.constant 0.000000e+00 : f32
    %29 = vector.broadcast %cst_20 : f32 to vector<16x128xf32>
    %30 = arith.maximumf %28, %29 : vector<16x128xf32>
    %31 = arith.mulf %30, %17 : vector<16x128xf32>
    %32 = arith.truncf %31 : vector<16x128xf32> to vector<16x128xbf16>
    %c0_21 = arith.constant 0 : index
    %c0_22 = arith.constant 0 : index
    %33 = vector.load %arg8[%c0_21, %c0_22] : memref<128x128xbf16, #tpu.memory_space<vmem>>, vector<128x128xbf16>
    %c0_23 = arith.constant 0 : index
    %c0_24 = arith.constant 0 : index
    %34 = vector.load %arg9[%c0_23, %c0_24] : memref<1x128xf32, #tpu.memory_space<vmem>>, vector<1x128xf32>
    %cst_25 = arith.constant dense<0.000000e+00> : vector<16x128xf32>
    %35 = tpu.matmul %32, %33, %cst_25 {dimension_numbers = #tpu.dot_dimension_numbers<[1], [0], [0], [1], [0, 0, 1, 1], [], []>} : vector<16x128xbf16>, vector<128x128xbf16>, vector<16x128xf32> -> vector<16x128xf32>
    %36 = arith.truncf %35 : vector<16x128xf32> to vector<16x128xbf16>
    %37 = vector.shape_cast %36 : vector<16x128xbf16> to vector<1x16x128xbf16>
    "tpu.trace_start"() <{level = 10 : i32, message = "bij,bjf->bif"}> : () -> ()
    %cst_26 = arith.constant dense<0.000000e+00> : vector<1x16x128xf32>
    %38 = tpu.matmul %2, %37, %cst_26 {dimension_numbers = #tpu.dot_dimension_numbers<[2], [1], [1], [2], [0, 0, 0, 1, 1, 2], [0], [0]>} : vector<1x16x16xbf16>, vector<1x16x128xbf16>, vector<1x16x128xf32> -> vector<1x16x128xf32>
    "tpu.trace_stop"() : () -> ()
    %39 = vector.shape_cast %38 : vector<1x16x128xf32> to vector<16x128xf32>
    %40 = vector.broadcast %34 : vector<1x128xf32> to vector<16x128xf32>
    %41 = arith.addf %39, %40 : vector<16x128xf32>
    %cst_27 = arith.constant 0.000000e+00 : f32
    %42 = vector.broadcast %cst_27 : f32 to vector<16x128xf32>
    %43 = arith.maximumf %41, %42 : vector<16x128xf32>
    %44 = arith.mulf %43, %17 : vector<16x128xf32>
    %c0_28 = arith.constant 0 : index
    %c0_29 = arith.constant 0 : index
    %45 = vector.load %arg10[%c0_28, %c0_29] : memref<128x128xbf16, #tpu.memory_space<vmem>>, vector<128x128xbf16>
    %c0_30 = arith.constant 0 : index
    %c0_31 = arith.constant 0 : index
    %46 = vector.load %arg11[%c0_30, %c0_31] : memref<1x128xf32, #tpu.memory_space<vmem>>, vector<1x128xf32>
    %cst_32 = arith.constant dense<0.000000e+00> : vector<16x128xf32>
    %47 = tpu.matmul %1, %45, %cst_32 {dimension_numbers = #tpu.dot_dimension_numbers<[1], [0], [0], [1], [0, 0, 1, 1], [], []>} : vector<16x128xbf16>, vector<128x128xbf16>, vector<16x128xf32> -> vector<16x128xf32>
    %48 = vector.broadcast %46 : vector<1x128xf32> to vector<16x128xf32>
    %49 = arith.addf %47, %48 : vector<16x128xf32>
    %50 = arith.addf %44, %49 : vector<16x128xf32>
    %51 = arith.mulf %50, %17 : vector<16x128xf32>
    %52 = vector.shape_cast %51 : vector<16x128xf32> to vector<1x16x128xf32>
    %c0_33 = arith.constant 0 : index
    %c0_34 = arith.constant 0 : index
    %c0_35 = arith.constant 0 : index
    %53 = vector.load %arg12[%c0_33, %c0_34, %c0_35] : memref<1x16x128xf32, #tpu.memory_space<vmem>>, vector<1x16x128xf32>
    tpu.vector_store %arg12[%c0_33, %c0_34, %c0_35], %52 {strides = array<i32>} : memref<1x16x128xf32, #tpu.memory_space<vmem>>, vector<1x16x128xf32>,
    return
  }
  func.func @transform_0(%arg0: i32) -> (i32, i32, i32) {
    %c0_i32 = arith.constant 0 : i32
    %c0_i32_0 = arith.constant 0 : i32
    %c0_i32_1 = arith.constant 0 : i32
    return %arg0, %c0_i32, %c0_i32_0 : i32, i32, i32
  }
  func.func @transform_1(%arg0: i32) -> (i32, i32, i32) {
    %c0_i32 = arith.constant 0 : i32
    %c0_i32_0 = arith.constant 0 : i32
    %c0_i32_1 = arith.constant 0 : i32
    return %arg0, %c0_i32, %c0_i32_0 : i32, i32, i32
  }
  func.func @transform_2(%arg0: i32) -> (i32, i32, i32) {
    %c0_i32 = arith.constant 0 : i32
    %c0_i32_0 = arith.constant 0 : i32
    %c0_i32_1 = arith.constant 0 : i32
    return %arg0, %c0_i32, %c0_i32_0 : i32, i32, i32
  }
  func.func @transform_3(%arg0: i32) -> (i32, i32) {
    %c0_i32 = arith.constant 0 : i32
    %c0_i32_0 = arith.constant 0 : i32
    %c0_i32_1 = arith.constant 0 : i32
    return %c0_i32, %c0_i32_0 : i32, i32
  }
  func.func @transform_4(%arg0: i32) -> (i32, i32) {
    %c0_i32 = arith.constant 0 : i32
    %c0_i32_0 = arith.constant 0 : i32
    %c0_i32_1 = arith.constant 0 : i32
    return %c0_i32, %c0_i32_0 : i32, i32
  }
  func.func @transform_5(%arg0: i32) -> (i32, i32) {
    %c0_i32 = arith.constant 0 : i32
    %c0_i32_0 = arith.constant 0 : i32
    %c0_i32_1 = arith.constant 0 : i32
    return %c0_i32, %c0_i32_0 : i32, i32
  }
  func.func @transform_6(%arg0: i32) -> (i32, i32) {
    %c0_i32 = arith.constant 0 : i32
    %c0_i32_0 = arith.constant 0 : i32
    %c0_i32_1 = arith.constant 0 : i32
    return %c0_i32, %c0_i32_0 : i32, i32
  }
  func.func @transform_7(%arg0: i32) -> (i32, i32) {
    %c0_i32 = arith.constant 0 : i32
    %c0_i32_0 = arith.constant 0 : i32
    %c0_i32_1 = arith.constant 0 : i32
    return %c0_i32, %c0_i32_0 : i32, i32
  }
  func.func @transform_8(%arg0: i32) -> (i32, i32) {
    %c0_i32 = arith.constant 0 : i32
    %c0_i32_0 = arith.constant 0 : i32
    %c0_i32_1 = arith.constant 0 : i32
    return %c0_i32, %c0_i32_0 : i32, i32
  }
  func.func @transform_9(%arg0: i32) -> (i32, i32) {
    %c0_i32 = arith.constant 0 : i32
    %c0_i32_0 = arith.constant 0 : i32
    %c0_i32_1 = arith.constant 0 : i32
    return %c0_i32, %c0_i32_0 : i32, i32
  }
  func.func @transform_10(%arg0: i32) -> (i32, i32) {
    %c0_i32 = arith.constant 0 : i32
    %c0_i32_0 = arith.constant 0 : i32
    %c0_i32_1 = arith.constant 0 : i32
    return %c0_i32, %c0_i32_0 : i32, i32
  }
  func.func @transform_11(%arg0: i32) -> (i32, i32, i32) {
    %c0_i32 = arith.constant 0 : i32
    %c0_i32_0 = arith.constant 0 : i32
    %c0_i32_1 = arith.constant 0 : i32
    return %arg0, %c0_i32, %c0_i32_0 : i32, i32, i32
  }
}

module attributes {stable_mosaic.version = 11 : i64} {
  func.func @kernel(%arg0: i32, %arg1: memref<1x16x128xbf16, #tpu.memory_space<vmem>>, %arg2: memref<1x16x16xbf16, #tpu.memory_space<vmem>>, %arg3: memref<1x16x1xf32, #tpu.memory_space<vmem>>, %arg4: memref<128x128xbf16, #tpu.memory_space<vmem>>, %arg5: memref<1x128xf32, #tpu.memory_space<vmem>>, %arg6: memref<128x128xbf16, #tpu.memory_space<vmem>>, %arg7: memref<1x128xf32, #tpu.memory_space<vmem>>, %arg8: memref<128x128xbf16, #tpu.memory_space<vmem>>, %arg9: memref<1x128xf32, #tpu.memory_space<vmem>>, %arg10: memref<128x128xbf16, #tpu.memory_space<vmem>>, %arg11: memref<1x128xf32, #tpu.memory_space<vmem>>, %arg12: memref<1x16x128xf32, #tpu.memory_space<vmem>>) attributes {dimension_semantics = [#tpu.dimension_semantics<parallel>], iteration_bounds = array<i64: 2>, scalar_prefetch = 0 : i64, scratch_operands = 0 : i64, tpu.core_type = #tpu.core_type<tc>, window_params = [{transform_indices = @transform_0, window_bounds = array<i64: 1, 16, 128>}, {transform_indices = @transform_1, window_bounds = array<i64: 1, 16, 16>}, {transform_indices = @transform_2, window_bounds = array<i64: 1, 16, 1>}, {pipeline_mode = #tpu.pipeline_mode<synchronous>, transform_indices = @transform_3, window_bounds = array<i64: 128, 128>}, {pipeline_mode = #tpu.pipeline_mode<synchronous>, transform_indices = @transform_4, window_bounds = array<i64: 1, 128>}, {pipeline_mode = #tpu.pipeline_mode<synchronous>, transform_indices = @transform_5, window_bounds = array<i64: 128, 128>}, {pipeline_mode = #tpu.pipeline_mode<synchronous>, transform_indices = @transform_6, window_bounds = array<i64: 1, 128>}, {pipeline_mode = #tpu.pipeline_mode<synchronous>, transform_indices = @transform_7, window_bounds = array<i64: 128, 128>}, {pipeline_mode = #tpu.pipeline_mode<synchronous>, transform_indices = @transform_8, window_bounds = array<i64: 1, 128>}, {pipeline_mode = #tpu.pipeline_mode<synchronous>, transform_indices = @transform_9, window_bounds = array<i64: 128, 128>}, {pipeline_mode = #tpu.pipeline_mode<synchronous>, transform_indices = @transform_10, window_bounds = array<i64: 1, 128>}, {transform_indices = @transform_11, window_bounds = array<i64: 1, 16, 128>}]} {
    %c0 = arith.constant 0 : index
    %c0_0 = arith.constant 0 : index
    %c0_1 = arith.constant 0 : index
    %0 = vector.load %arg1[%c0, %c0_0, %c0_1] : memref<1x16x128xbf16, #tpu.memory_space<vmem>>, vector<1x16x128xbf16>
    %1 = vector.shape_cast %0 : vector<1x16x128xbf16> to vector<16x128xbf16>
    %c0_2 = arith.constant 0 : index
    %c0_3 = arith.constant 0 : index
    %c0_4 = arith.constant 0 : index
    %2 = vector.load %arg2[%c0_2, %c0_3, %c0_4] : memref<1x16x16xbf16, #tpu.memory_space<vmem>>, vector<1x16x16xbf16>
    %c0_5 = arith.constant 0 : index
    %c0_6 = arith.constant 0 : index
    %c0_7 = arith.constant 0 : index
    %3 = vector.load %arg3[%c0_5, %c0_6, %c0_7] : memref<1x16x1xf32, #tpu.memory_space<vmem>>, vector<1x16x1xf32>
    %4 = vector.shape_cast %3 : vector<1x16x1xf32> to vector<16x1xf32>
    %c0_8 = arith.constant 0 : index
    %c0_9 = arith.constant 0 : index
    %5 = vector.load %arg4[%c0_8, %c0_9] : memref<128x128xbf16, #tpu.memory_space<vmem>>, vector<128x128xbf16>
    %c0_10 = arith.constant 0 : index
    %c0_11 = arith.constant 0 : index
    %6 = vector.load %arg5[%c0_10, %c0_11] : memref<1x128xf32, #tpu.memory_space<vmem>>, vector<1x128xf32>
    %cst = arith.constant dense<0.000000e+00> : vector<16x128xf32>
    %7 = tpu.matmul %1, %5, %cst {dimension_numbers = #tpu.dot_dimension_numbers<[1], [0], [0], [1], [0, 0, 1, 1], [], []>} : vector<16x128xbf16>, vector<128x128xbf16>, vector<16x128xf32> -> vector<16x128xf32>
    %8 = arith.truncf %7 : vector<16x128xf32> to vector<16x128xbf16>
    %9 = vector.shape_cast %8 : vector<16x128xbf16> to vector<1x16x128xbf16>
    "tpu.trace_start"() <{level = 10 : i32, message = "bij,bjf->bif"}> : () -> ()
    %cst_12 = arith.constant dense<0.000000e+00> : vector<1x16x128xf32>
    %10 = tpu.matmul %2, %9, %cst_12 {dimension_numbers = #tpu.dot_dimension_numbers<[2], [1], [1], [2], [0, 0, 0, 1, 1, 2], [0], [0]>} : vector<1x16x16xbf16>, vector<1x16x128xbf16>, vector<1x16x128xf32> -> vector<1x16x128xf32>
    "tpu.trace_stop"() : () -> ()
    %11 = vector.shape_cast %10 : vector<1x16x128xf32> to vector<16x128xf32>
    %12 = vector.broadcast %6 : vector<1x128xf32> to vector<16x128xf32>
    %13 = arith.addf %11, %12 : vector<16x128xf32>
    %cst_13 = arith.constant 0.000000e+00 : f32
    %14 = vector.broadcast %cst_13 : f32 to vector<16x128xf32>
    %15 = arith.maximumf %13, %14 : vector<16x128xf32>
    %16 = vector.shape_cast %4 : vector<16x1xf32> to vector<16x1xf32>
    %17 = vector.broadcast %16 : vector<16x1xf32> to vector<16x128xf32>
    %18 = arith.mulf %15, %17 : vector<16x128xf32>
    %19 = arith.truncf %18 : vector<16x128xf32> to vector<16x128xbf16>
    %c0_14 = arith.constant 0 : index
    %c0_15 = arith.constant 0 : index
    %20 = vector.load %arg6[%c0_14, %c0_15] : memref<128x128xbf16, #tpu.memory_space<vmem>>, vector<128x128xbf16>
    %c0_16 = arith.constant 0 : index
    %c0_17 = arith.constant 0 : index
    %21 = vector.load %arg7[%c0_16, %c0_17] : memref<1x128xf32, #tpu.memory_space<vmem>>, vector<1x128xf32>
    %cst_18 = arith.constant dense<0.000000e+00> : vector<16x128xf32>
    %22 = tpu.matmul %19, %20, %cst_18 {dimension_numbers = #tpu.dot_dimension_numbers<[1], [0], [0], [1], [0, 0, 1, 1], [], []>} : vector<16x128xbf16>, vector<128x128xbf16>, vector<16x128xf32> -> vector<16x128xf32>
    %23 = arith.truncf %22 : vector<16x128xf32> to vector<16x128xbf16>
    %24 = vector.shape_cast %23 : vector<16x128xbf16> to vector<1x16x128xbf16>
    "tpu.trace_start"() <{level = 10 : i32, message = "bij,bjf->bif"}> : () -> ()
    %cst_19 = arith.constant dense<0.000000e+00> : vector<1x16x128xf32>
    %25 = tpu.matmul %2, %24, %cst_19 {dimension_numbers = #tpu.dot_dimension_numbers<[2], [1], [1], [2], [0, 0, 0, 1, 1, 2], [0], [0]>} : vector<1x16x16xbf16>, vector<1x16x128xbf16>, vector<1x16x128xf32> -> vector<1x16x128xf32>
    "tpu.trace_stop"() : () -> ()
    %26 = vector.shape_cast %25 : vector<1x16x128xf32> to vector<16x128xf32>
    %27 = vector.broadcast %21 : vector<1x128xf32> to vector<16x128xf32>
    %28 = arith.addf %26, %27 : vector<16x128xf32>
    %cst_20 = arith.constant 0.000000e+00 : f32
    %29 = vector.broadcast %cst_20 : f32 to vector<16x128xf32>
    %30 = arith.maximumf %28, %29 : vector<16x128xf32>
    %31 = arith.mulf %30, %17 : vector<16x128xf32>
    %32 = arith.truncf %31 : vector<16x128xf32> to vector<16x128xbf16>
    %c0_21 = arith.constant 0 : index
    %c0_22 = arith.constant 0 : index
    %33 = vector.load %arg8[%c0_21, %c0_22] : memref<128x128xbf16, #tpu.memory_space<vmem>>, vector<128x128xbf16>
    %c0_23 = arith.constant 0 : index
    %c0_24 = arith.constant 0 : index
    %34 = vector.load %arg9[%c0_23, %c0_24] : memref<1x128xf32, #tpu.memory_space<vmem>>, vector<1x128xf32>
    %cst_25 = arith.constant dense<0.000000e+00> : vector<16x128xf32>
    %35 = tpu.matmul %32, %33, %cst_25 {dimension_numbers = #tpu.dot_dimension_numbers<[1], [0], [0], [1], [0, 0, 1, 1], [], []>} : vector<16x128xbf16>, vector<128x128xbf16>, vector<16x128xf32> -> vector<16x128xf32>
    %36 = arith.truncf %35 : vector<16x128xf32> to vector<16x128xbf16>
    %37 = vector.shape_cast %36 : vector<16x128xbf16> to vector<1x16x128xbf16>
    "tpu.trace_start"() <{level = 10 : i32, message = "bij,bjf->bif"}> : () -> ()
    %cst_26 = arith.constant dense<0.000000e+00> : vector<1x16x128xf32>
    %38 = tpu.matmul %2, %37, %cst_26 {dimension_numbers = #tpu.dot_dimension_numbers<[2], [1], [1], [2], [0, 0, 0, 1, 1, 2], [0], [0]>} : vector<1x16x16xbf16>, vector<1x16x128xbf16>, vector<1x16x128xf32> -> vector<1x16x128xf32>
    "tpu.trace_stop"() : () -> ()
    %39 = vector.shape_cast %38 : vector<1x16x128xf32> to vector<16x128xf32>
    %40 = vector.broadcast %34 : vector<1x128xf32> to vector<16x128xf32>
    %41 = arith.addf %39, %40 : vector<16x128xf32>
    %cst_27 = arith.constant 0.000000e+00 : f32
    %42 = vector.broadcast %cst_27 : f32 to vector<16x128xf32>
    %43 = arith.maximumf %41, %42 : vector<16x128xf32>
    %44 = arith.mulf %43, %17 : vector<16x128xf32>
    %c0_28 = arith.constant 0 : index
    %c0_29 = arith.constant 0 : index
    %45 = vector.load %arg10[%c0_28, %c0_29] : memref<128x128xbf16, #tpu.memory_space<vmem>>, vector<128x128xbf16>
    %c0_30 = arith.constant 0 : index
    %c0_31 = arith.constant 0 : index
    %46 = vector.load %arg11[%c0_30, %c0_31] : memref<1x128xf32, #tpu.memory_space<vmem>>, vector<1x128xf32>
    %cst_32 = arith.constant dense<0.000000e+00> : vector<16x128xf32>
    %47 = tpu.matmul %1, %45, %cst_32 {dimension_numbers = #tpu.dot_dimension_numbers<[1], [0], [0], [1], [0, 0, 1, 1], [], []>} : vector<16x128xbf16>, vector<128x128xbf16>, vector<16x128xf32> -> vector<16x128xf32>
    %48 = vector.broadcast %46 : vector<1x128xf32> to vector<16x128xf32>
    %49 = arith.addf %47, %48 : vector<16x128xf32>
    %50 = arith.addf %44, %49 : vector<16x128xf32>
    %51 = arith.mulf %50, %17 : vector<16x128xf32>
    %52 = vector.shape_cast %51 : vector<16x128xf32> to vector<1x16x128xf32>
    %c0_33 = arith.constant 0 : index
    %c0_34 = arith.constant 0 : index
    %c0_35 = arith.constant 0 : index
    %53 = vector.load %arg12[%c0_33, %c0_34, %c0_35] : memref<1x16x128xf32, #tpu.memory_space<vmem>>, vector<1x16x128xf32>
    tpu.vector_store %arg12[%c0_33, %c0_34, %c0_35], %52 {strides = array<i32>} : memref<1x16x128xf32, #tpu.memory_space<vmem>>, vector<1x16x128xf32>,
    return
  }
  func.func @transform_0(%arg0: i32) -> (i32, i32, i32) {
    %c0_i32 = arith.constant 0 : i32
    %c0_i32_0 = arith.constant 0 : i32
    %c0_i32_1 = arith.constant 0 : i32
    return %arg0, %c0_i32, %c0_i32_0 : i32, i32, i32
  }
  func.func @transform_1(%arg0: i32) -> (i32, i32, i32) {
    %c0_i32 = arith.constant 0 : i32
    %c0_i32_0 = arith.constant 0 : i32
    %c0_i32_1 = arith.constant 0 : i32
    return %arg0, %c0_i32, %c0_i32_0 : i32, i32, i32
  }
  func.func @transform_2(%arg0: i32) -> (i32, i32, i32) {
    %c0_i32 = arith.constant 0 : i32
    %c0_i32_0 = arith.constant 0 : i32
    %c0_i32_1 = arith.constant 0 : i32
    return %arg0, %c0_i32, %c0_i32_0 : i32, i32, i32
  }
  func.func @transform_3(%arg0: i32) -> (i32, i32) {
    %c0_i32 = arith.constant 0 : i32
    %c0_i32_0 = arith.constant 0 : i32
    %c0_i32_1 = arith.constant 0 : i32
    return %c0_i32, %c0_i32_0 : i32, i32
  }
  func.func @transform_4(%arg0: i32) -> (i32, i32) {
    %c0_i32 = arith.constant 0 : i32
    %c0_i32_0 = arith.constant 0 : i32
    %c0_i32_1 = arith.constant 0 : i32
    return %c0_i32, %c0_i32_0 : i32, i32
  }
  func.func @transform_5(%arg0: i32) -> (i32, i32) {
    %c0_i32 = arith.constant 0 : i32
    %c0_i32_0 = arith.constant 0 : i32
    %c0_i32_1 = arith.constant 0 : i32
    return %c0_i32, %c0_i32_0 : i32, i32
  }
  func.func @transform_6(%arg0: i32) -> (i32, i32) {
    %c0_i32 = arith.constant 0 : i32
    %c0_i32_0 = arith.constant 0 : i32
    %c0_i32_1 = arith.constant 0 : i32
    return %c0_i32, %c0_i32_0 : i32, i32
  }
  func.func @transform_7(%arg0: i32) -> (i32, i32) {
    %c0_i32 = arith.constant 0 : i32
    %c0_i32_0 = arith.constant 0 : i32
    %c0_i32_1 = arith.constant 0 : i32
    return %c0_i32, %c0_i32_0 : i32, i32
  }
  func.func @transform_8(%arg0: i32) -> (i32, i32) {
    %c0_i32 = arith.constant 0 : i32
    %c0_i32_0 = arith.constant 0 : i32
    %c0_i32_1 = arith.constant 0 : i32
    return %c0_i32, %c0_i32_0 : i32, i32
  }
  func.func @transform_9(%arg0: i32) -> (i32, i32) {
    %c0_i32 = arith.constant 0 : i32
    %c0_i32_0 = arith.constant 0 : i32
    %c0_i32_1 = arith.constant 0 : i32
    return %c0_i32, %c0_i32_0 : i32, i32
  }
  func.func @transform_10(%arg0: i32) -> (i32, i32) {
    %c0_i32 = arith.constant 0 : i32
    %c0_i32_0 = arith.constant 0 : i32
    %c0_i32_1 = arith.constant 0 : i32
    return %c0_i32, %c0_i32_0 : i32, i32
  }
  func.func @transform_11(%arg0: i32) -> (i32, i32, i32) {
    %c0_i32 = arith.constant 0 : i32
    %c0_i32_0 = arith.constant 0 : i32
    %c0_i32_1 = arith.constant 0 : i32
    return %arg0, %c0_i32, %c0_i32_0 : i32, i32, i32
  }
}

</mosaic_0001>

<bundles_post_ra>
// kernel: tpu_custom_call.1
= control target key start
LH: loop header
LB: loop body
LE: loop exit
PB: predicated region body
PF: predicated region fallthrough
CT: control target
= control target key end

     0   :  { %s2354_s0 = inlined_call_operand.hbm [shape: bf16[2,16,128], index: 0, kind: input, shape index: {}]   ;;  %s2355_s1 = inlined_call_operand.hbm [shape: bf16[2,16,16], index: 1, kind: input, shape index: {}]   ;;  %s2356_s2 = inlined_call_operand.vmem [shape: f32[2,16,1], index: 2, kind: input, shape index: {}]   ;;  %s2357_s3 = inlined_call_operand.hbm [shape: bf16[128,128], index: 3, kind: input, shape index: {}]   ;;  %s2358_s4 = inlined_call_operand.vmem [shape: f32[1,128], index: 4, kind: input, shape index: {}]   ;;  %s2359_s5 = inlined_call_operand.hbm [shape: bf16[128,128], index: 5, kind: input, shape index: {}]   ;;  %s2360_s6 = inlined_call_operand.vmem [shape: f32[1,128], index: 6, kind: input, shape index: {}]   ;;  %s2361_s7 = inlined_call_operand.hbm [shape: bf16[128,128], index: 7, kind: input, shape index: {}]   ;;  %s2362_s8 = inlined_call_operand.vmem [shape: f32[1,128], index: 8, kind: input, shape index: {}]   ;;  %s2363_s9 = inlined_call_operand.vmem [shape: bf16[128,128], index: 9, kind: input, shape index: {}]   ;;  %s2364_s10 = inlined_call_operand.vmem [shape: f32[1,128], index: 10, kind: input, shape index: {}]   ;;  %s2365_s11 = inlined_call_operand.hbm [shape: f32[2,16,128], index: 11, kind: output, shape index: {}]  }
   0x1   :  { %2376 = sst [smem:[#allocation20_spill]] %s2354_s0 }
   0x2   :  { %2377 = sst [smem:[#allocation21_spill]] %s2357_s3 }
   0x3   :  { %2378 = sst [smem:[#allocation22_spill]] %s2359_s5 }
   0x4   :  { %2379 = sst [smem:[#allocation23_spill]] %s2361_s7 }
   0x5   :  { %2380 = sst [smem:[#allocation24_spill]] %s2362_s8 }
   0x6   :  { %2381 = sst [smem:[#allocation25_spill]] %s2364_s10 }
   0x7   :  { %2382 = sst [smem:[#allocation26_spill]] %s2365_s11 }
   0x8   :  { %16 = vsyncpa [#allocation3], 0 }
   0x9   :  { %18 = vsyncpa [#allocation3 + $0x1], 0 }
   0xa   :  { %19 = vsyncpa [#allocation6], 0 }
   0xb   :  { %21 = vsyncpa [#allocation6 + $0x1], 0 }
   0xc   :  { %22 = vsyncpa [#allocation9], 0 }
   0xd   :  { %23 = vsyncpa [#allocation4], 0 }
   0xe   :  { %25 = vsyncpa [#allocation4 + $0x1], 0  ;;  %s1916_s17 = smov 0   ;;  %s1918_s18 = smov 0  }
   0xf   :  { %s1920_s19 = smov 0   ;;  %s1922_s20 = smov 0  }
  0x10 LB: > { %2383 = sst [smem:[#allocation17_spill]] %s1829_s17  ;;  %s1937_s21 = sadd.s32 4294967295, %s1841_s20   ;;  %s1841_s20 = sphi %s1922_s20, %s2417_s20   ;;  %s1837_s19 = sphi %s1920_s19, %s2416_s19   ;;  %s1833_s18 = sphi %s1918_s18, %s2415_s18   ;;  %s1829_s17 = sphi %s1916_s17, %s2414_s17  }
  0x11   : > { %s1284_s22 = sadd.s32 4294967294, %s1841_s20   ;;  %p51_p0 = scmp.ne.s32.totalorder %s1833_s18, %s1829_s17 }
  0x12   : > { %p2367_p1 = scmp.eq.s32.totalorder %s1937_s21, 0  ;;  %p301_p3 = scmp.eq.s32.totalorder %s1284_s22, 1 }
  0x13   : > { %p1285_p5 = scmp.ge.s32.totalorder %s1841_s20, 1  ;;  %p308_p7 = scmp.lt.s32.totalorder %s1841_s20, 3 }
  0x14   : > { %p1946_p4 = por %p2367_p1, %p51_p0  ;;  %p1951_p6 = por %p301_p3, %p51_p0 }
  0x15   : > { %p1956_p8 = pnand %p1285_p5, %p308_p7  ;;  %s1843_s26 = smov [#allocation7]  }
  0x16   : > { %s2384_s23 = scalar_select %p1946_p4, 1, 0 }
  0x17   : > { %s2385_s24 = scalar_select %p1951_p6, 1, 0 }
  0x18   : > { %s2387_s25 = scalar_select %p1956_p8, 1, 0 }
  0x19   : > { %2386 = sst [smem:[#allocation18_spill]] %s2385_s24  ;;  %s320_s27 = sshll.u32 %s1843_s26, 4  ;;  %s1960_s27 = int_to_ptr.vmem [resolvable:$true] %s320_s27 }
  0x1a   : > { %p1513_p9 = pneg %p1956_p8  ;;  %s1844_s29 = smov [#allocation8]  }
  0x1b   : > { %s336_s30 = sshll.u32 %s1844_s29, 4  ;;  %s1845_s12 = smov [#allocation10]   ;;  %s1971_s30 = int_to_ptr.vmem [resolvable:$true] %s336_s30 }
  0x1c   : > { %p1967_p11 = pnand %p1513_p9, %p2367_p1  ;;  %s1973_s13 = sshll.u32 %s1845_s12, 4  ;;  %s353_s13 = int_to_ptr.vmem [resolvable:$true] %s1973_s13 }
  0x1d   : > { %s2389_s3 = sld [smem:[#allocation21_spill]] }
  0x1e   : > { %p1983_p13 = pneg %p1967_p11 }
  0x23   : > { %s1619_s16 = scalar_lea.hbm %s2389_s3, 1024 }
  0x24   : > { %p1620_p12 = scmp.ne.s32.totalorder %s2389_s3, %s1619_s16  ;;  %p1626_p5 = scmp.lt.u32.totalorder %s1619_s16, %s2389_s3 }
  0x26   : > { %p1622_p0 = pnand %p1983_p13, %p1620_p12 }
  0x28   : > { %p1623_p3 = pneg %p1622_p0 }
  0x2a   : > { %p1628_p7 = pnand %p1626_p5, %p1623_p3 }
  0x2c   : > { %1631 = shalt.err (!%p1628_p7)
}
  0x2d   : > { %s1632_s14 = scalar_lea.vmem %s1960_s27, 1024  ;;  %p1640_p2 = scmp.lt.s32.totalorder %s1960_s27, %s1960_s27 }
  0x2e   : > { %p1633_p9 = scmp.ne.s32.totalorder %s1960_s27, %s1632_s14  ;;  %p1641_p6 = scmp.lt.s32.totalorder %s1632_s14, %s1632_s14 }
  0x30   : > { %p1635_p10 = pnand %p1633_p9, %p1983_p13  ;;  %p1642_p12 = por %p1641_p6, %p1640_p2 }
  0x32   : > { %p1636_p1 = pneg %p1635_p10 }
  0x34   : > { %p1643_p0 = pnand %p1642_p12, %p1636_p1 }
  0x36   : > { %1646 = shalt.err (!%p1643_p0)
}
  0x37   : > { %s2372_s15 = smov 64   ;;  %s2374_s16 = smov 4  }
  0x38   : > { %1516 = dma.hbm_to_vmem [thread:$0]  (!%p1967_p11), %s2389_s3, 1024, %s1960_s27, [#allocation6], %s2372_s15, %s2372_s15, %s2374_s16  }
  0x39   : > { %s2391_s5 = sld [smem:[#allocation22_spill]] }
  0x3f   : > { %s1647_s14 = scalar_lea.hbm %s2391_s5, 1024 }
  0x40   : > { %p1648_p1 = scmp.ne.s32.totalorder %s2391_s5, %s1647_s14  ;;  %p1654_p10 = scmp.lt.u32.totalorder %s1647_s14, %s2391_s5 }
  0x42   : > { %p1650_p2 = pnand %p1648_p1, %p1983_p13 }
  0x44   : > { %p1651_p6 = pneg %p1650_p2 }
  0x46   : > { %p1656_p3 = pnand %p1654_p10, %p1651_p6 }
  0x48   : > { %1659 = shalt.err (!%p1656_p3)
}
  0x49   : > { %s1660_s27 = scalar_lea.vmem %s1971_s30, 1024  ;;  %p1668_p12 = scmp.lt.s32.totalorder %s1971_s30, %s1971_s30 }
  0x4a   : > { %p1661_p5 = scmp.ne.s32.totalorder %s1971_s30, %s1660_s27  ;;  %p1669_p0 = scmp.lt.s32.totalorder %s1660_s27, %s1660_s27 }
  0x4c   : > { %p1663_p7 = pnand %p1661_p5, %p1983_p13  ;;  %p1670_p1 = por %p1669_p0, %p1668_p12 }
  0x4e   : > { %p1664_p9 = pneg %p1663_p7 }
  0x50   : > { %p1671_p2 = pnand %p1670_p1, %p1664_p9 }
  0x52   : > { %1674 = shalt.err (!%p1671_p2)
}
  0x53   : > { %1519 = dma.hbm_to_vmem [thread:$0]  (!%p1967_p11), %s2391_s5, 1024, %s1971_s30, [#allocation9], %s2372_s15, %s2372_s15, %s2374_s16  }
  0x54   : > { %s2392_s7 = sld [smem:[#allocation23_spill]] }
  0x5a   : > { %s1675_s22 = scalar_lea.hbm %s2392_s7, 1024 }
  0x5b   : > { %p1676_p6 = scmp.ne.s32.totalorder %s2392_s7, %s1675_s22  ;;  %p1682_p5 = scmp.lt.u32.totalorder %s1675_s22, %s2392_s7 }
  0x5d   : > { %p1678_p10 = pnand %p1676_p6, %p1983_p13 }
  0x5f   : > { %p1679_p3 = pneg %p1678_p10 }
  0x61   : > { %p1684_p7 = pnand %p1682_p5, %p1679_p3 }
  0x63   : > { %1687 = shalt.err (!%p1684_p7)
}
  0x64   : > { %s1688_s27 = scalar_lea.vmem %s353_s13, 1024  ;;  %p1696_p1 = scmp.lt.s32.totalorder %s353_s13, %s353_s13 }
  0x65   : > { %p1689_p9 = scmp.ne.s32.totalorder %s353_s13, %s1688_s27  ;;  %p1697_p2 = scmp.lt.s32.totalorder %s1688_s27, %s1688_s27 }
  0x67   : > { %p1691_p12 = pnand %p1689_p9, %p1983_p13  ;;  %p1698_p4 = por %p1697_p2, %p1696_p1 }
  0x69   : > { %p1692_p0 = pneg %p1691_p12 }
  0x6b   : > { %p1699_p8 = pnand %p1698_p4, %p1692_p0 }
  0x6d   : > { %1702 = shalt.err (!%p1699_p8)
}
  0x6e   : > { %1522 = dma.hbm_to_vmem [thread:$0]  (!%p1967_p11), %s2392_s7, 1024, %s353_s13, [#allocation9], %s2372_s15, %s2372_s15, %s2374_s16  }
  0x6f   : > { %s2056_s24 = sadd.s32 1, %s1841_s20   ;;  %s38_s10 = sadd.s32 1, %s1837_s19 }
  0x70   : > { %s35_s28 = ssub.s32 %s1841_s20, %s2056_s24  ;;  %p45_p8 = scmp.ne.s32.totalorder %s1837_s19, %s1833_s18 }
  0x71   : > { %p36_p4 = scmp.eq.s32.totalorder %s35_s28, 0  ;;  %p46_p13 = scmp.eq.s32.totalorder %s1841_s20, 0 }
  0x72   : > { %p1537_p6 = scmp.lt.s32.totalorder %s1841_s20, 2  ;;  %p2394_p3 = scmp.eq.s32.totalorder %s1937_s21, 1 }
  0x73   : > { %s2066_s11 = scalar_select %p36_p4, %s1837_s19, %s38_s10  }
  0x74   : > { %p47_p10 = por %p46_p13, %p45_p8  ;;  %p2070_p5 = por %p2394_p3, %p45_p8 }
  0x75   : > { %2393 = sst [smem:[#allocation19_spill]] %s2066_s11  ;;  %s375_s22 = sand.u32 1, %s1837_s19  }
  0x76   : > { %s1351_s26 = sshll.u32 %s1841_s20, 7  ;;  %s2076_s13 = sshll.u32 %s375_s22, 3 }
  0x77   : > { %s2396_s0 = sld [smem:[#allocation20_spill]]  ;;  %s379_s27 = scalar_lea.vmem [#allocation2], %s2076_s13 }
  0x78   : > { %s386_s30 = sshll.u32 %s379_s27, 4  ;;  %p2084_p11 = pnand %p1537_p6, %p47_p10  ;;  %s2088_s30 = int_to_ptr.vmem [resolvable:$true] %s386_s30 }
  0x79   : > { %s2093_s29 = scalar_lea.hbm %s2355_s1, %s1351_s26  ;;  %s2095_s12 = scalar_lea.sflag [#allocation3], %s375_s22 }
  0x7a   : > { %p1705_p9 = pneg %p2084_p11 }
  0x7d   : > { %s2081_s14 = scalar_lea.hbm %s2396_s0, %s1351_s26  ;;  %s1708_s3 = scalar_lea.hbm %s2396_s0, 256 }
  0x7e   : > { %s1703_s15 = scalar_lea.hbm %s2081_s14, 128  ;;  %p1709_p1 = scmp.lt.u32.totalorder %s2081_s14, %s2396_s0 }
  0x7f   : > { %p1704_p7 = scmp.ne.s32.totalorder %s2081_s14, %s1703_s15  ;;  %p1710_p2 = scmp.lt.u32.totalorder %s1708_s3, %s1703_s15 }
  0x80   : > { %p1712_p8 = scmp.lt.u32.totalorder %s1703_s15, %s2081_s14 }
  0x81   : > { %p1706_p12 = pnand %p1705_p9, %p1704_p7  ;;  %p1711_p4 = por %p1710_p2, %p1709_p1 }
  0x83   : > { %p1707_p0 = pneg %p1706_p12  ;;  %p1713_p13 = por %p1712_p8, %p1711_p4 }
  0x85   : > { %p1714_p6 = pnand %p1713_p13, %p1707_p0 }
  0x87   : > { %1717 = shalt.err (!%p1714_p6)
}
  0x88   : > { %s1718_s22 = scalar_lea.vmem %s2088_s30, 128  ;;  %s1848_s16 = smov [#allocation2]  }
  0x89   : > { %p1719_p10 = scmp.ne.s32.totalorder %s2088_s30, %s1718_s22  ;;  %s1723_s26 = sshll.u32 %s1848_s16, 4  ;;  %s1724_s26 = int_to_ptr.vmem [resolvable:$false] %s1723_s26 }
  0x8a   : > { %s1725_s5 = scalar_lea.vmem %s1724_s26, 256  ;;  %p1726_p12 = scmp.lt.s32.totalorder %s2088_s30, %s1724_s26 }
  0x8b   : > { %p1721_p3 = pnand %p1719_p10, %p1705_p9  ;;  %p1727_p1 = scmp.lt.s32.totalorder %s1725_s5, %s1718_s22 }
  0x8d   : > { %p1722_p7 = pneg %p1721_p3  ;;  %p1728_p2 = por %p1727_p1, %p1726_p12 }
  0x8f   : > { %p1729_p4 = pnand %p1728_p2, %p1722_p7 }
  0x91   : > { %1732 = shalt.err (!%p1729_p4)
}
  0x92   : > { %s2398_s3 = smov 4   ;;  %s2399_s7 = smov 64  }
  0x93   : > { %1526 = dma.hbm_to_vmem [thread:$0]  (!%p2084_p11), %s2081_s14, 128, %s2088_s30, %s2095_s12, %s2399_s7, %s2399_s7, %s2398_s3  }
  0x94   : > { %s400_s15 = scalar_lea.vmem [#allocation5], %s2076_s13  ;;  %s396_s10 = sand.u32 1, %s1841_s20  }
  0x95   : > { %s407_s28 = sshll.u32 %s400_s15, 4  ;;  %s2130_s27 = scalar_lea.sflag [#allocation6], %s396_s10  ;;  %s2128_s28 = int_to_ptr.vmem [resolvable:$true] %s407_s28 }
  0x96   : > { %s1733_s22 = scalar_lea.hbm %s2093_s29, 128  ;;  %s1738_s5 = scalar_lea.hbm %s2355_s1, 256 }
  0x97   : > { %p1734_p0 = scmp.ne.s32.totalorder %s2093_s29, %s1733_s22  ;;  %p1739_p6 = scmp.lt.u32.totalorder %s2093_s29, %s2355_s1 }
  0x98   : > { %p1740_p10 = scmp.lt.u32.totalorder %s1738_s5, %s1733_s22  ;;  %p1742_p7 = scmp.lt.u32.totalorder %s1733_s22, %s2093_s29 }
  0x99   : > { %p1736_p8 = pnand %p1734_p0, %p1705_p9 }
  0x9a   : > { %p1741_p3 = por %p1740_p10, %p1739_p6 }
  0x9b   : > { %p1737_p13 = pneg %p1736_p8 }
  0x9c   : > { %p1743_p12 = por %p1742_p7, %p1741_p3 }
  0x9e   : > { %p1744_p1 = pnand %p1743_p12, %p1737_p13 }
  0xa0   : > { %1747 = shalt.err (!%p1744_p1)
}
  0xa1   : > { %s1748_s13 = scalar_lea.vmem %s2128_s28, 128  ;;  %s1849_s14 = smov [#allocation5]  }
  0xa2   : > { %p1749_p2 = scmp.ne.s32.totalorder %s2128_s28, %s1748_s13  ;;  %s1753_s30 = sshll.u32 %s1849_s14, 4  ;;  %s1754_s30 = int_to_ptr.vmem [resolvable:$false] %s1753_s30 }
  0xa3   : > { %s1755_s0 = scalar_lea.vmem %s1754_s30, 256  ;;  %p1756_p8 = scmp.lt.s32.totalorder %s2128_s28, %s1754_s30 }
  0xa4   : > { %p1751_p4 = pnand %p1749_p2, %p1705_p9  ;;  %p1757_p6 = scmp.lt.s32.totalorder %s1755_s0, %s1748_s13 }
  0xa6   : > { %p1752_p0 = pneg %p1751_p4  ;;  %p1758_p10 = por %p1757_p6, %p1756_p8 }
  0xa8   : > { %p1759_p3 = pnand %p1758_p10, %p1752_p0 }
  0xaa   : > { %1762 = shalt.err (!%p1759_p3)
}
  0xab   : > { %1529 = dma.hbm_to_vmem [thread:$0]  (!%p2084_p11), %s2093_s29, 128, %s2128_s28, %s2130_s27, %s2399_s7, %s2399_s7, %s2398_s3  }
  0xac   : > { %p2400_p9 = scmp.ne.s32.totalorder %s2387_s25, 0 }
  0xad   : > { %s2162_s11 = sand.u32 (!%p2400_p9), 1, %s1833_s18   ;;  %p2401_p13 = scmp.ne.s32.totalorder (!%p2400_p9), %s2384_s23, 0 }
  0xae   : > { %427 = sbr.rel (%p2400_p9) target bundleno = 1594 (0x63a), region = 64  ;;  %s1297_s12 = sshll.u32 (!%p2400_p9), %s2162_s11, 3 }
  0xaf   : > { %s430_s15 = scalar_lea.sflag (!%p2400_p9), [#allocation3], %s2162_s11  ;;  %s2166_s10 = scalar_lea.vmem (!%p2400_p9), [#allocation2], %s1297_s12 }
  0xb5   : > { %1808 = dma.done.wait (%p2401_p13), %s430_s15, 128  }
  0xb6   : > { %1810 = vsyncadd (%p2401_p13), %s430_s15, 4294967168  ;;  %s438_s8 = sand.u32 1, %s1937_s21   ;;  %s2173_s29 = scalar_lea.vmem [#allocation5], %s1297_s12 }
  0xb7   : > { %s439_s25 = scalar_lea.sflag [#allocation6], %s438_s8 }
  0xb8   : > { %1812 = dma.done.wait (%p2401_p13), %s439_s25, 128  }
  0xb9   : > { %1814 = vsyncadd (%p2401_p13), %s439_s25, 4294967168  ;;  %p2402_p11 = scmp.eq.s32.totalorder %s1937_s21, 0 }
  0xbb   : > { %1816 = dma.done.wait (%p2402_p11), [#allocation6], 1024   ;;  %p2403_p7 = pmov %p2402_p11 }
  0xbd   : > { %1818 = vsyncadd (%p2403_p7), [#allocation6], 4294966272  ;;  %p2404_p12 = pmov %p2403_p7 }
  0xbe   : > { %p2405_p1 = pmov %p2403_p7 }
  0xbf   : > { %1820 = dma.done.wait (%p2404_p12), [#allocation9], 2048  }
  0xc0   : > { %1822 = vsyncadd (%p2405_p1), [#allocation9], 4294965248  ;;  %v1850_v0 = vmov 0.0   ;;  %vm1851_vm0 = vmmov 0   ;;  %v1585_v1 = vld [vmem:[#allocation7] sm:$0xff]   ;;  %v1586_v2 = vld [vmem:[#allocation7 + $0x8] sm:$0xff]  }
  0xc1   : > { %1397 = vmatprep.subr.bf16.mxu0 %v1850_v0  ;;  %1413 = vmatprep.mubr.msk.bf16.mxu0 %vm1851_vm0, %v1850_v0  ;;  %v1587_v3 = vld [vmem:[#allocation7 + $0x10] sm:$0xff]   ;;  %v1588_v4 = vld [vmem:[#allocation7 + $0x18] sm:$0xff]   ;;  %v1589_v5 = vld [vmem:[#allocation7 + $0x20] sm:$0xff]   ;;  %p503_p2 = scmp.lt.s32.totalorder %s1937_s21, 1  ;;  %v1852_v10 = vmov 0   ;;  %vm639_vm1 = vcmask 130048  }
  0xc2   : > { %1417 = vmatprep.subr.bf16.mxu1 %v1850_v0  ;;  %1419 = vmatprep.mubr.msk.bf16.mxu1 %vm1851_vm0, %v1850_v0  ;;  %v1590_v6 = vld [vmem:[#allocation7 + $0x28] sm:$0xff]   ;;  %v1591_v7 = vld [vmem:[#allocation7 + $0x30] sm:$0xff]   ;;  %v1592_v8 = vld [vmem:[#allocation7 + $0x38] sm:$0xff]   ;;  %s2406_s5 = sld [smem:[#allocation24_spill]]  ;;  %s1302_s13 = sshll.u32 %s2162_s11, 4 }
  0xc3   : > { %1398 = vmatpush3.bf16.msra.mxu0 %v1585_v1  ;;  %v2201_v9 = vld [vmem:[%s2166_s10] sm:$0xff]   ;;  %1584 = vset.pattern.permute.xlu0 %v1852_v10  ;;  %s504_s23 = scalar_select %p503_p2, %s1937_s21, 1  ;;  %v2213_v18 = vld [vmem:[%s2173_s29] sm:$0xff]  }
  0xc4   : > { %1399 = vmatprep.subr.bf16.mxu0 %v1850_v0  ;;  %v1595_v19 = vld [vmem:[#allocation8] sm:$0xff]   ;;  %v1596_v20 = vld [vmem:[#allocation8 + $0x8] sm:$0xff]   ;;  %v1597_v21 = vld [vmem:[#allocation8 + $0x10] sm:$0xff]   ;;  %s2407_s0 = sld [smem:[#allocation25_spill]]  ;;  %s502_s12 = scalar_lea.vmem [#allocation11], %s1302_s13 }
  0xc5   : > { %s1353_s3 = sshll.u32 %s504_s23, 4  ;;  %v1598_v22 = vld [vmem:[#allocation8 + $0x18] sm:$0xff]   ;;  %v1599_v23 = vld [vmem:[#allocation8 + $0x20] sm:$0xff]   ;;  %v1600_v24 = vld [vmem:[#allocation8 + $0x28] sm:$0xff]   ;;  %s1148_s15 = sshll.u32 %s502_s12, 4  ;;  %s2304_s15 = int_to_ptr.vmem [resolvable:$true] %s1148_s15 }
  0xc6   : > { %s507_s27 = scalar_lea.vmem %s2356_s2, %s1353_s3  ;;  %v1601_v25 = vld [vmem:[#allocation8 + $0x30] sm:$0xff]   ;;  %v1602_v26 = vld [vmem:[#allocation8 + $0x38] sm:$0xff]   ;;  %v1314_v27 = vld [vmem:[%s2358_s4] ss:$0 sm:$0xff]  ;;  %s1354_s10 = sshll.u32 %s1937_s21, 8 }
  0xc7   : > { %1400 = vmatpush3.bf16.msra.mxu0 %v1586_v2  ;;  %v513_v11 = vld [vmem:[%s507_s27] sm:$0xff]  ;;  %v514_v12 = vld [vmem:[%s507_s27 + $0x8] sm:$0xff]  ;;  %v1605_v48 = vld [vmem:[#allocation10 + $0x10] sm:$0xff]   ;;  %s2408_s29 = sld [smem:[#allocation26_spill]]  ;;  %s1135_s3 = scalar_lea.sflag [#allocation4], %s2162_s11 }
  0xc8   : > { %1401 = vmatprep.subr.bf16.mxu0 %v1850_v0  ;;  %688 = vperm.xlu0 %1584, %v513_v11   ;;  %v1603_v46 = vld [vmem:[#allocation10] sm:$0xff]   ;;  %v1604_v47 = vld [vmem:[#allocation10 + $0x8] sm:$0xff]   ;;  %v1606_v49 = vld [vmem:[#allocation10 + $0x18] sm:$0xff]   ;;  %s1763_s7 = scalar_lea.vmem %s2304_s15, 256  ;;  %s1853_s21 = smov [#allocation11]  }
  0xc9   : > { %v1607_v50 = vld [vmem:[#allocation10 + $0x20] sm:$0xff]   ;;  %v1608_v51 = vld [vmem:[#allocation10 + $0x28] sm:$0xff]   ;;  %v1609_v52 = vld [vmem:[#allocation10 + $0x30] sm:$0xff]   ;;  %p1764_p4 = scmp.ne.s32.totalorder %s2304_s15, %s1763_s7  ;;  %s1767_s28 = sshll.u32 %s1853_s21, 4  ;;  %s1768_s28 = int_to_ptr.vmem [resolvable:$false] %s1767_s28 }
  0xca   : > { %v1610_v53 = vld [vmem:[#allocation10 + $0x38] sm:$0xff]   ;;  %v1325_v54 = vld [vmem:[%s2360_s6] ss:$0 sm:$0xff]  ;;  %v1612_v10 = vld [vmem:[%s2363_s9 + $0x8] sm:$0xff]   ;;  %s1769_s27 = scalar_lea.vmem %s1768_s28, 512  ;;  %p1770_p6 = scmp.lt.s32.totalorder %s2304_s15, %s1768_s28 }
  0xcb   : > { %1402 = vmatpush3.bf16.msra.mxu0 %v1587_v3  ;;  %v1613_v11 = vld [vmem:[%s2363_s9 + $0x10] sm:$0xff]   ;;  %p1765_p0 = pnand %p1764_p4, %p2070_p5  ;;  %p1771_p10 = scmp.lt.s32.totalorder %s1769_s27, %s1763_s7 }
  0xcc   : > { %1403 = vmatprep.subr.bf16.mxu0 %v1850_v0  ;;  %693 = vperm.xlu0 %1584, %v514_v12   ;;  %v1614_v12 = vld [vmem:[%s2363_s9 + $0x18] sm:$0xff]  }
  0xcd   : > { %s2309_s23 = scalar_lea.hbm %s2408_s29, %s1354_s10  ;;  %p1766_p8 = pneg %p1765_p0 }
  0xce   : > { %p1772_p3 = por %p1771_p10, %p1770_p6 }
  0xcf   : > { %1404 = vmatpush3.bf16.msra.mxu0 %v1588_v4 }
  0xd0   : > { %1405 = vmatprep.subr.bf16.mxu0 %v1850_v0  ;;  %p1773_p9 = pnand %p1772_p3, %p1766_p8 }
  0xd3   : > { %1406 = vmatpush3.bf16.msra.mxu0 %v1589_v5 }
  0xd4   : > { %1407 = vmatprep.subr.bf16.mxu0 %v1850_v0 }
  0xd7   : > { %1408 = vmatpush3.bf16.msra.mxu0 %v1590_v6 }
  0xd8   : > { %1409 = vmatprep.subr.bf16.mxu0 %v1850_v0 }
  0xdb   : > { %1410 = vmatpush3.bf16.msra.mxu0 %v1591_v7 }
  0xdc   : > { %1411 = vmatprep.subr.bf16.mxu0 %v1850_v0 }
  0xdf   : > { %1412 = vmatpush3.bf16.msra.mxu0 %v1592_v8  ;;  %v1611_v8 = vld [vmem:[%s2363_s9] sm:$0xff]  }
  0xe0   : > { %1469 = vmatprep.subr.bf16.mxu0 %v1850_v0 }
  0xe2   : > { %1414 = vmatmul.mubr.bf16.vlgmr.msra.gmra.mrb[0].mxu0 %v2201_v9 }
  0xe3   : > { %1471 = vmatprep.mubr.msk.bf16.mxu0 %vm1851_vm0, %v1850_v0 }
 0x147   : > { %v2231_v28 = vpop.permute.xlu0 %688 }
 0x14b   : > { %v2233_v37 = vpop.permute.xlu0 %693 }
 0x1b5   : > { %v620_v13 = vpop.f32.mrb[0].mxu0 }
 0x1b6   : > { %v1415_v14 = vpop.f32.mrb[1].mxu0 }
 0x1b7   : > { %v623_v15 = vpop.f32.mrb[2].mxu0  ;;  %v1616_v14 = vld [vmem:[%s2363_s9 + $0x28] sm:$0xff]  }
 0x1b8   : > { %v627_v16 = vpack.c.bf16 %v623_v15, %v620_v13  ;;  %v1416_v17 = vpop.f32.mrb[3].mxu0  ;;  %v1615_v13 = vld [vmem:[%s2363_s9 + $0x20] sm:$0xff]   ;;  %v1617_v15 = vld [vmem:[%s2363_s9 + $0x30] sm:$0xff]  }
 0x1ba   : > { %1418 = vmatpush3.bf16.msra.mxu1 %v627_v16  ;;  %v1618_v16 = vld [vmem:[%s2363_s9 + $0x38] sm:$0xff]  }
 0x1bb   : > { %1423 = vmatprep.subr.bf16.mxu1 %v1850_v0 }
 0x1bd   : > { %1420 = vmatmul.mubr.msk.bf16.vlgmr.msra.gmra.mrb[0].mxu1 %vm639_vm1, %v2213_v18 }
 0x1be   : > { %1424 = vmatpush3.bf16.msra.mxu1 %v1595_v19  ;;  %1439 = vmatprep.mubr.msk.bf16.mxu1 %vm1851_vm0, %v1850_v0 }
 0x1bf   : > { %1425 = vmatprep.subr.bf16.mxu1 %v1850_v0 }
 0x1c2   : > { %1426 = vmatpush3.bf16.msra.mxu1 %v1596_v20 }
 0x1c3   : > { %1427 = vmatprep.subr.bf16.mxu1 %v1850_v0 }
 0x1c6   : > { %1428 = vmatpush3.bf16.msra.mxu1 %v1597_v21  ;;  %v1335_v21 = vld [vmem:[%s2406_s5] ss:$0 sm:$0xff] }
 0x1c7   : > { %1429 = vmatprep.subr.bf16.mxu1 %v1850_v0 }
 0x1ca   : > { %1430 = vmatpush3.bf16.msra.mxu1 %v1598_v22 }
 0x1cb   : > { %1431 = vmatprep.subr.bf16.mxu1 %v1850_v0 }
 0x1ce   : > { %1432 = vmatpush3.bf16.msra.mxu1 %v1599_v23 }
 0x1cf   : > { %1433 = vmatprep.subr.bf16.mxu1 %v1850_v0 }
 0x1d2   : > { %1434 = vmatpush3.bf16.msra.mxu1 %v1600_v24 }
 0x1d3   : > { %1435 = vmatprep.subr.bf16.mxu1 %v1850_v0 }
 0x1d6   : > { %1436 = vmatpush3.bf16.msra.mxu1 %v1601_v25 }
 0x1d7   : > { %1437 = vmatprep.subr.bf16.mxu1 %v1850_v0 }
 0x1da   : > { %1438 = vmatpush3.bf16.msra.mxu1 %v1602_v26 }
 0x1db   : > { %1443 = vmatprep.subr.bf16.mxu1 %v1850_v0 }
 0x290   : > { %v677_v29 = vpop.f32.mrb[0].mxu1 }
 0x291   : > { %v678_v30 = vadd.f32 %v1314_v27, %v677_v29  ;;  %v1421_v31 = vpop.f32.mrb[1].mxu1 }
 0x292   : > { %v680_v32 = vpop.f32.mrb[2].mxu1 }
 0x293   : > { %v684_v33 = vmax.f32 %v678_v30, 0.0  ;;  %v681_v34 = vadd.f32 %v1314_v27, %v680_v32  ;;  %v1422_v35 = vpop.f32.mrb[3].mxu1 }
 0x295   : > { %v685_v36 = vmax.f32 %v681_v34, 0.0  ;;  %v696_v38 = vmul.f32 %v2231_v28, %v684_v33 }
 0x297   : > { %v697_v39 = vmul.f32 %v2233_v37, %v685_v36 }
 0x299   : > { %v698_v40 = vpack.c.bf16 %v697_v39, %v696_v38 }
 0x29b   : > { %1440 = vmatmul.mubr.bf16.vlgmr.msra.gmra.mrb[4].mxu1 %v698_v40 }
 0x29c   : > { %1445 = vmatprep.mubr.msk.bf16.mxu1 %vm1851_vm0, %v1850_v0 }
 0x36e   : > { %v798_v41 = vpop.f32.mrb[4].mxu1 }
 0x36f   : > { %v1441_v42 = vpop.f32.mrb[5].mxu1 }
 0x370   : > { %v801_v43 = vpop.f32.mrb[6].mxu1 }
 0x371   : > { %v805_v44 = vpack.c.bf16 %v801_v43, %v798_v41  ;;  %v1442_v45 = vpop.f32.mrb[7].mxu1 }
 0x373   : > { %1444 = vmatpush3.bf16.msra.mxu1 %v805_v44 }
 0x374   : > { %1449 = vmatprep.subr.bf16.mxu1 %v1850_v0 }
 0x376   : > { %1446 = vmatmul.mubr.msk.bf16.vlgmr.msra.gmra.mrb[8].mxu1 %vm639_vm1, %v2213_v18 }
 0x377   : > { %1450 = vmatpush3.bf16.msra.mxu1 %v1603_v46  ;;  %1465 = vmatprep.mubr.msk.bf16.mxu1 %vm1851_vm0, %v1850_v0 }
 0x378   : > { %1451 = vmatprep.subr.bf16.mxu1 %v1850_v0 }
 0x37b   : > { %1452 = vmatpush3.bf16.msra.mxu1 %v1604_v47 }
 0x37c   : > { %1453 = vmatprep.subr.bf16.mxu1 %v1850_v0 }
 0x37f   : > { %1454 = vmatpush3.bf16.msra.mxu1 %v1605_v48 }
 0x380   : > { %1455 = vmatprep.subr.bf16.mxu1 %v1850_v0 }
 0x383   : > { %1456 = vmatpush3.bf16.msra.mxu1 %v1606_v49 }
 0x384   : > { %1457 = vmatprep.subr.bf16.mxu1 %v1850_v0 }
 0x387   : > { %1458 = vmatpush3.bf16.msra.mxu1 %v1607_v50 }
 0x388   : > { %1459 = vmatprep.subr.bf16.mxu1 %v1850_v0 }
 0x38b   : > { %1460 = vmatpush3.bf16.msra.mxu1 %v1608_v51 }
 0x38c   : > { %1461 = vmatprep.subr.bf16.mxu1 %v1850_v0 }
 0x38f   : > { %1462 = vmatpush3.bf16.msra.mxu1 %v1609_v52 }
 0x390   : > { %1463 = vmatprep.subr.bf16.mxu1 %v1850_v0 }
 0x393   : > { %1464 = vmatpush3.bf16.msra.mxu1 %v1610_v53 }
 0x449   : > { %v846_v55 = vpop.f32.mrb[8].mxu1 }
 0x44a   : > { %v847_v56 = vadd.f32 %v1325_v54, %v846_v55  ;;  %v1447_v57 = vpop.f32.mrb[9].mxu1 }
 0x44b   : > { %v849_v58 = vpop.f32.mrb[10].mxu1 }
 0x44c   : > { %v853_v59 = vmax.f32 %v847_v56, 0.0  ;;  %v850_v60 = vadd.f32 %v1325_v54, %v849_v58  ;;  %v1448_v61 = vpop.f32.mrb[11].mxu1 }
 0x44e   : > { %v854_v62 = vmax.f32 %v850_v60, 0.0  ;;  %v855_v63 = vmul.f32 %v853_v59, %v2231_v28 }
 0x450   : > { %v856_v1 = vmul.f32 %v854_v62, %v2233_v37 }
 0x452   : > { %v857_v2 = vpack.c.bf16 %v856_v1, %v855_v63 }
 0x454   : > { %1466 = vmatmul.mubr.bf16.vlgmr.msra.gmra.mrb[12].mxu1 %v857_v2 }
 0x527   : > { %v957_v3 = vpop.f32.mrb[12].mxu1 }
 0x528   : > { %v1467_v4 = vpop.f32.mrb[13].mxu1 }
 0x529   : > { %v960_v5 = vpop.f32.mrb[14].mxu1 }
 0x52a   : > { %v964_v6 = vpack.c.bf16 %v960_v5, %v957_v3  ;;  %v1468_v7 = vpop.f32.mrb[15].mxu1 }
 0x52c   : > { %1470 = vmatpush3.bf16.msra.mxu0 %v964_v6 }
 0x52d   : > { %1475 = vmatprep.subr.bf16.mxu0 %v1850_v0 }
 0x52f   : > { %1472 = vmatmul.mubr.msk.bf16.vlgmr.msra.gmra.mrb[4].mxu0 %vm639_vm1, %v2213_v18 }
 0x530   : > { %1476 = vmatpush3.bf16.msra.mxu0 %v1611_v8  ;;  %1491 = vmatprep.mubr.msk.bf16.mxu0 %vm1851_vm0, %v1850_v0 }
 0x531   : > { %1477 = vmatprep.subr.bf16.mxu0 %v1850_v0 }
 0x534   : > { %1478 = vmatpush3.bf16.msra.mxu0 %v1612_v10 }
 0x535   : > { %1479 = vmatprep.subr.bf16.mxu0 %v1850_v0 }
 0x538   : > { %1480 = vmatpush3.bf16.msra.mxu0 %v1613_v11 }
 0x539   : > { %1481 = vmatprep.subr.bf16.mxu0 %v1850_v0 }
 0x53c   : > { %1482 = vmatpush3.bf16.msra.mxu0 %v1614_v12 }
 0x53d   : > { %1483 = vmatprep.subr.bf16.mxu0 %v1850_v0 }
 0x540   : > { %1484 = vmatpush3.bf16.msra.mxu0 %v1615_v13 }
 0x541   : > { %1485 = vmatprep.subr.bf16.mxu0 %v1850_v0 }
 0x544   : > { %1486 = vmatpush3.bf16.msra.mxu0 %v1616_v14 }
 0x545   : > { %1487 = vmatprep.subr.bf16.mxu0 %v1850_v0 }
 0x548   : > { %1488 = vmatpush3.bf16.msra.mxu0 %v1617_v15 }
 0x549   : > { %1489 = vmatprep.subr.bf16.mxu0 %v1850_v0  ;;  %v1337_v0 = vld [vmem:[%s2407_s0] ss:$0 sm:$0xff] }
 0x54c   : > { %1490 = vmatpush3.bf16.msra.mxu0 %v1618_v16 }
 0x54f   : > { %1492 = vmatmul.mubr.bf16.vlgmr.msra.gmra.mrb[8].mxu0 %v2201_v9 }
 0x602   : > { %v1005_v17 = vpop.f32.mrb[4].mxu0 }
 0x603   : > { %v1473_v18 = vpop.f32.mrb[5].mxu0  ;;  %v1006_v22 = vadd.f32 %v1335_v21, %v1005_v17 }
 0x604   : > { %v1008_v19 = vpop.f32.mrb[6].mxu0 }
 0x605   : > { %v1474_v20 = vpop.f32.mrb[7].mxu0  ;;  %v1009_v23 = vadd.f32 %v1335_v21, %v1008_v19  ;;  %v1012_v24 = vmax.f32 %v1006_v22, 0.0 }
 0x607   : > { %v1013_v25 = vmax.f32 %v1009_v23, 0.0  ;;  %v1014_v9 = vmul.f32 %v1012_v24, %v2231_v28 }
 0x609   : > { %v1015_v31 = vmul.f32 %v1013_v25, %v2233_v37 }
 0x622   : > { %v1121_v26 = vpop.f32.mrb[8].mxu0 }
 0x623   : > { %v1122_v27 = vadd.f32 %v1337_v0, %v1121_v26  ;;  %v1493_v29 = vpop.f32.mrb[9].mxu0 }
 0x624   : > { %v1124_v30 = vpop.f32.mrb[10].mxu0 }
 0x625   : > { %v1128_v32 = vadd.f32 %v1122_v27, %v1014_v9  ;;  %v1125_v33 = vadd.f32 %v1337_v0, %v1124_v30  ;;  %v1494_v34 = vpop.f32.mrb[11].mxu0 }
 0x627   : > { %v1130_v35 = vmul.f32 %v1128_v32, %v2231_v28  ;;  %v1129_v36 = vadd.f32 %v1125_v33, %v1015_v31 }
 0x629   : > { %1132 = vst [vmem:[%s502_s12] sm:$0xff] %v1130_v35  ;;  %v1131_v38 = vmul.f32 %v1129_v36, %v2233_v37 }
 0x62b   : > { %1133 = vst [vmem:[%s502_s12 + $0x8] sm:$0xff] %v1131_v38 }
 0x62c   : > { %1776 = shalt.err (!%p1773_p9)
}
 0x62d   : > { %s1777_s22 = scalar_lea.hbm %s2309_s23, 256  ;;  %s1781_s5 = scalar_lea.hbm %s2408_s29, 512 }
 0x62e   : > { %p1778_p13 = scmp.ne.s32.totalorder %s2309_s23, %s1777_s22  ;;  %p1782_p12 = scmp.lt.u32.totalorder %s2309_s23, %s2408_s29 }
 0x62f   : > { %p1783_p1 = scmp.lt.u32.totalorder %s1781_s5, %s1777_s22  ;;  %p1785_p4 = scmp.lt.u32.totalorder %s1777_s22, %s2309_s23 }
 0x630   : > { %p1779_p11 = pnand %p1778_p13, %p2070_p5 }
 0x631   : > { %p1784_p2 = por %p1783_p1, %p1782_p12 }
 0x632   : > { %p1780_p7 = pneg %p1779_p11 }
 0x633   : > { %p1786_p0 = por %p1785_p4, %p1784_p2 }
 0x635   : > { %p1787_p8 = pnand %p1786_p0, %p1780_p7 }
 0x637   : > { %1790 = shalt.err (!%p1787_p8)
}
 0x638   : > { %s1854_s30 = smov 128   ;;  %s1855_s0 = smov 8  }
 0x639   : > { %1511 = dma.vmem_to_hbm [thread:$0]  (%p2070_p5), %s2304_s15, 256, %s2309_s23, %s1135_s3, %s1854_s30, %s1854_s30, %s1855_s0  }
 0x63a PF: > { %s2409_s12 = sld [smem:[#allocation17_spill]]  ;;  %s2410_s10 = sld [smem:[#allocation18_spill]] }
 0x63b   : > { %p2412_p10 = scmp.ge.s32.totalorder %s1841_s20, 2 }
 0x640   : > { %s1163_s8 = sand.u32 1, %s2409_s12   ;;  %p2411_p6 = scmp.ne.s32.totalorder %s2410_s10, 0 }
 0x641   : > { %s1164_s25 = scalar_lea.sflag [#allocation4], %s1163_s8 }
 0x642   : > { %p1531_p3 = pnand %p2412_p10, %p2411_p6 }
 0x644   : > { %1824 = dma.done.wait (!%p1531_p3), %s1164_s25, 256  }
 0x645   : > { %1826 = vsyncadd (!%p1531_p3), %s1164_s25, 4294967040  ;;  %s2413_s7 = sld [smem:[#allocation19_spill]]  ;;  %p28_p9 = scmp.ge.s32.totalorder %s2056_s24, 4  }
 0x646   : > { %s2414_s17 = smov %s1833_s18  ;;  %s2415_s18 = smov %s1837_s19 }
 0x647   : > { %s2417_s20 = smov %s2056_s24  ;;  %30 = sbr.rel (!%p28_p9) target bundleno = 16 (0x10), region = 137 }
 0x64b   : > { %s2416_s19 = smov %s2413_s7 }
 0x64e   :  { %1169 = vsyncpa [#allocation3], 1 }
 0x64f   :  { %1171 = vsyncpa [#allocation3 + $0x1], 1 }
 0x650   :  { %1172 = vsyncpa [#allocation6], 1 }
 0x651   :  { %1174 = vsyncpa [#allocation6 + $0x1], 1 }
 0x652   :  { %1175 = vsyncpa [#allocation9], 1 }
 0x653   :  { %1176 = vsyncpa [#allocation4], 1 }
 0x654   :  { %1178 = vsyncpa [#allocation4 + $0x1], 1 }

// kernel: tpu_custom_call.1
= control target key start
LH: loop header
LB: loop body
LE: loop exit
PB: predicated region body
PF: predicated region fallthrough
CT: control target
= control target key end

     0   :  { %s2354_s0 = inlined_call_operand.hbm [shape: bf16[2,16,128], index: 0, kind: input, shape index: {}]   ;;  %s2355_s1 = inlined_call_operand.hbm [shape: bf16[2,16,16], index: 1, kind: input, shape index: {}]   ;;  %s2356_s2 = inlined_call_operand.vmem [shape: f32[2,16,1], index: 2, kind: input, shape index: {}]   ;;  %s2357_s3 = inlined_call_operand.hbm [shape: bf16[128,128], index: 3, kind: input, shape index: {}]   ;;  %s2358_s4 = inlined_call_operand.vmem [shape: f32[1,128], index: 4, kind: input, shape index: {}]   ;;  %s2359_s5 = inlined_call_operand.hbm [shape: bf16[128,128], index: 5, kind: input, shape index: {}]   ;;  %s2360_s6 = inlined_call_operand.vmem [shape: f32[1,128], index: 6, kind: input, shape index: {}]   ;;  %s2361_s7 = inlined_call_operand.hbm [shape: bf16[128,128], index: 7, kind: input, shape index: {}]   ;;  %s2362_s8 = inlined_call_operand.vmem [shape: f32[1,128], index: 8, kind: input, shape index: {}]   ;;  %s2363_s9 = inlined_call_operand.vmem [shape: bf16[128,128], index: 9, kind: input, shape index: {}]   ;;  %s2364_s10 = inlined_call_operand.vmem [shape: f32[1,128], index: 10, kind: input, shape index: {}]   ;;  %s2365_s11 = inlined_call_operand.hbm [shape: f32[2,16,128], index: 11, kind: output, shape index: {}]  }
   0x1   :  { %2376 = sst [smem:[#allocation20_spill]] %s2354_s0 }
   0x2   :  { %2377 = sst [smem:[#allocation21_spill]] %s2357_s3 }
   0x3   :  { %2378 = sst [smem:[#allocation22_spill]] %s2359_s5 }
   0x4   :  { %2379 = sst [smem:[#allocation23_spill]] %s2361_s7 }
   0x5   :  { %2380 = sst [smem:[#allocation24_spill]] %s2362_s8 }
   0x6   :  { %2381 = sst [smem:[#allocation25_spill]] %s2364_s10 }
   0x7   :  { %2382 = sst [smem:[#allocation26_spill]] %s2365_s11 }
   0x8   :  { %16 = vsyncpa [#allocation3], 0 }
   0x9   :  { %18 = vsyncpa [#allocation3 + $0x1], 0 }
   0xa   :  { %19 = vsyncpa [#allocation6], 0 }
   0xb   :  { %21 = vsyncpa [#allocation6 + $0x1], 0 }
   0xc   :  { %22 = vsyncpa [#allocation9], 0 }
   0xd   :  { %23 = vsyncpa [#allocation4], 0 }
   0xe   :  { %25 = vsyncpa [#allocation4 + $0x1], 0  ;;  %s1916_s17 = smov 0   ;;  %s1918_s18 = smov 0  }
   0xf   :  { %s1920_s19 = smov 0   ;;  %s1922_s20 = smov 0  }
  0x10 LB: > { %2383 = sst [smem:[#allocation17_spill]] %s1829_s17  ;;  %s1937_s21 = sadd.s32 4294967295, %s1841_s20   ;;  %s1841_s20 = sphi %s1922_s20, %s2417_s20   ;;  %s1837_s19 = sphi %s1920_s19, %s2416_s19   ;;  %s1833_s18 = sphi %s1918_s18, %s2415_s18   ;;  %s1829_s17 = sphi %s1916_s17, %s2414_s17  }
  0x11   : > { %s1284_s22 = sadd.s32 4294967294, %s1841_s20   ;;  %p51_p0 = scmp.ne.s32.totalorder %s1833_s18, %s1829_s17 }
  0x12   : > { %p2367_p1 = scmp.eq.s32.totalorder %s1937_s21, 0  ;;  %p301_p3 = scmp.eq.s32.totalorder %s1284_s22, 1 }
  0x13   : > { %p1285_p5 = scmp.ge.s32.totalorder %s1841_s20, 1  ;;  %p308_p7 = scmp.lt.s32.totalorder %s1841_s20, 3 }
  0x14   : > { %p1946_p4 = por %p2367_p1, %p51_p0  ;;  %p1951_p6 = por %p301_p3, %p51_p0 }
  0x15   : > { %p1956_p8 = pnand %p1285_p5, %p308_p7  ;;  %s1843_s26 = smov [#allocation7]  }
  0x16   : > { %s2384_s23 = scalar_select %p1946_p4, 1, 0 }
  0x17   : > { %s2385_s24 = scalar_select %p1951_p6, 1, 0 }
  0x18   : > { %s2387_s25 = scalar_select %p1956_p8, 1, 0 }
  0x19   : > { %2386 = sst [smem:[#allocation18_spill]] %s2385_s24  ;;  %s320_s27 = sshll.u32 %s1843_s26, 4  ;;  %s1960_s27 = int_to_ptr.vmem [resolvable:$true] %s320_s27 }
  0x1a   : > { %p1513_p9 = pneg %p1956_p8  ;;  %s1844_s29 = smov [#allocation8]  }
  0x1b   : > { %s336_s30 = sshll.u32 %s1844_s29, 4  ;;  %s1845_s12 = smov [#allocation10]   ;;  %s1971_s30 = int_to_ptr.vmem [resolvable:$true] %s336_s30 }
  0x1c   : > { %p1967_p11 = pnand %p1513_p9, %p2367_p1  ;;  %s1973_s13 = sshll.u32 %s1845_s12, 4  ;;  %s353_s13 = int_to_ptr.vmem [resolvable:$true] %s1973_s13 }
  0x1d   : > { %s2389_s3 = sld [smem:[#allocation21_spill]] }
  0x1e   : > { %p1983_p13 = pneg %p1967_p11 }
  0x23   : > { %s1619_s16 = scalar_lea.hbm %s2389_s3, 1024 }
  0x24   : > { %p1620_p12 = scmp.ne.s32.totalorder %s2389_s3, %s1619_s16  ;;  %p1626_p5 = scmp.lt.u32.totalorder %s1619_s16, %s2389_s3 }
  0x26   : > { %p1622_p0 = pnand %p1983_p13, %p1620_p12 }
  0x28   : > { %p1623_p3 = pneg %p1622_p0 }
  0x2a   : > { %p1628_p7 = pnand %p1626_p5, %p1623_p3 }
  0x2c   : > { %1631 = shalt.err (!%p1628_p7)
}
  0x2d   : > { %s1632_s14 = scalar_lea.vmem %s1960_s27, 1024  ;;  %p1640_p2 = scmp.lt.s32.totalorder %s1960_s27, %s1960_s27 }
  0x2e   : > { %p1633_p9 = scmp.ne.s32.totalorder %s1960_s27, %s1632_s14  ;;  %p1641_p6 = scmp.lt.s32.totalorder %s1632_s14, %s1632_s14 }
  0x30   : > { %p1635_p10 = pnand %p1633_p9, %p1983_p13  ;;  %p1642_p12 = por %p1641_p6, %p1640_p2 }
  0x32   : > { %p1636_p1 = pneg %p1635_p10 }
  0x34   : > { %p1643_p0 = pnand %p1642_p12, %p1636_p1 }
  0x36   : > { %1646 = shalt.err (!%p1643_p0)
}
  0x37   : > { %s2372_s15 = smov 64   ;;  %s2374_s16 = smov 4  }
  0x38   : > { %1516 = dma.hbm_to_vmem [thread:$0]  (!%p1967_p11), %s2389_s3, 1024, %s1960_s27, [#allocation6], %s2372_s15, %s2372_s15, %s2374_s16  }
  0x39   : > { %s2391_s5 = sld [smem:[#allocation22_spill]] }
  0x3f   : > { %s1647_s14 = scalar_lea.hbm %s2391_s5, 1024 }
  0x40   : > { %p1648_p1 = scmp.ne.s32.totalorder %s2391_s5, %s1647_s14  ;;  %p1654_p10 = scmp.lt.u32.totalorder %s1647_s14, %s2391_s5 }
  0x42   : > { %p1650_p2 = pnand %p1648_p1, %p1983_p13 }
  0x44   : > { %p1651_p6 = pneg %p1650_p2 }
  0x46   : > { %p1656_p3 = pnand %p1654_p10, %p1651_p6 }
  0x48   : > { %1659 = shalt.err (!%p1656_p3)
}
  0x49   : > { %s1660_s27 = scalar_lea.vmem %s1971_s30, 1024  ;;  %p1668_p12 = scmp.lt.s32.totalorder %s1971_s30, %s1971_s30 }
  0x4a   : > { %p1661_p5 = scmp.ne.s32.totalorder %s1971_s30, %s1660_s27  ;;  %p1669_p0 = scmp.lt.s32.totalorder %s1660_s27, %s1660_s27 }
  0x4c   : > { %p1663_p7 = pnand %p1661_p5, %p1983_p13  ;;  %p1670_p1 = por %p1669_p0, %p1668_p12 }
  0x4e   : > { %p1664_p9 = pneg %p1663_p7 }
  0x50   : > { %p1671_p2 = pnand %p1670_p1, %p1664_p9 }
  0x52   : > { %1674 = shalt.err (!%p1671_p2)
}
  0x53   : > { %1519 = dma.hbm_to_vmem [thread:$0]  (!%p1967_p11), %s2391_s5, 1024, %s1971_s30, [#allocation9], %s2372_s15, %s2372_s15, %s2374_s16  }
  0x54   : > { %s2392_s7 = sld [smem:[#allocation23_spill]] }
  0x5a   : > { %s1675_s22 = scalar_lea.hbm %s2392_s7, 1024 }
  0x5b   : > { %p1676_p6 = scmp.ne.s32.totalorder %s2392_s7, %s1675_s22  ;;  %p1682_p5 = scmp.lt.u32.totalorder %s1675_s22, %s2392_s7 }
  0x5d   : > { %p1678_p10 = pnand %p1676_p6, %p1983_p13 }
  0x5f   : > { %p1679_p3 = pneg %p1678_p10 }
  0x61   : > { %p1684_p7 = pnand %p1682_p5, %p1679_p3 }
  0x63   : > { %1687 = shalt.err (!%p1684_p7)
}
  0x64   : > { %s1688_s27 = scalar_lea.vmem %s353_s13, 1024  ;;  %p1696_p1 = scmp.lt.s32.totalorder %s353_s13, %s353_s13 }
  0x65   : > { %p1689_p9 = scmp.ne.s32.totalorder %s353_s13, %s1688_s27  ;;  %p1697_p2 = scmp.lt.s32.totalorder %s1688_s27, %s1688_s27 }
  0x67   : > { %p1691_p12 = pnand %p1689_p9, %p1983_p13  ;;  %p1698_p4 = por %p1697_p2, %p1696_p1 }
  0x69   : > { %p1692_p0 = pneg %p1691_p12 }
  0x6b   : > { %p1699_p8 = pnand %p1698_p4, %p1692_p0 }
  0x6d   : > { %1702 = shalt.err (!%p1699_p8)
}
  0x6e   : > { %1522 = dma.hbm_to_vmem [thread:$0]  (!%p1967_p11), %s2392_s7, 1024, %s353_s13, [#allocation9], %s2372_s15, %s2372_s15, %s2374_s16  }
  0x6f   : > { %s2056_s24 = sadd.s32 1, %s1841_s20   ;;  %s38_s10 = sadd.s32 1, %s1837_s19 }
  0x70   : > { %s35_s28 = ssub.s32 %s1841_s20, %s2056_s24  ;;  %p45_p8 = scmp.ne.s32.totalorder %s1837_s19, %s1833_s18 }
  0x71   : > { %p36_p4 = scmp.eq.s32.totalorder %s35_s28, 0  ;;  %p46_p13 = scmp.eq.s32.totalorder %s1841_s20, 0 }
  0x72   : > { %p1537_p6 = scmp.lt.s32.totalorder %s1841_s20, 2  ;;  %p2394_p3 = scmp.eq.s32.totalorder %s1937_s21, 1 }
  0x73   : > { %s2066_s11 = scalar_select %p36_p4, %s1837_s19, %s38_s10  }
  0x74   : > { %p47_p10 = por %p46_p13, %p45_p8  ;;  %p2070_p5 = por %p2394_p3, %p45_p8 }
  0x75   : > { %2393 = sst [smem:[#allocation19_spill]] %s2066_s11  ;;  %s375_s22 = sand.u32 1, %s1837_s19  }
  0x76   : > { %s1351_s26 = sshll.u32 %s1841_s20, 7  ;;  %s2076_s13 = sshll.u32 %s375_s22, 3 }
  0x77   : > { %s2396_s0 = sld [smem:[#allocation20_spill]]  ;;  %s379_s27 = scalar_lea.vmem [#allocation2], %s2076_s13 }
  0x78   : > { %s386_s30 = sshll.u32 %s379_s27, 4  ;;  %p2084_p11 = pnand %p1537_p6, %p47_p10  ;;  %s2088_s30 = int_to_ptr.vmem [resolvable:$true] %s386_s30 }
  0x79   : > { %s2093_s29 = scalar_lea.hbm %s2355_s1, %s1351_s26  ;;  %s2095_s12 = scalar_lea.sflag [#allocation3], %s375_s22 }
  0x7a   : > { %p1705_p9 = pneg %p2084_p11 }
  0x7d   : > { %s2081_s14 = scalar_lea.hbm %s2396_s0, %s1351_s26  ;;  %s1708_s3 = scalar_lea.hbm %s2396_s0, 256 }
  0x7e   : > { %s1703_s15 = scalar_lea.hbm %s2081_s14, 128  ;;  %p1709_p1 = scmp.lt.u32.totalorder %s2081_s14, %s2396_s0 }
  0x7f   : > { %p1704_p7 = scmp.ne.s32.totalorder %s2081_s14, %s1703_s15  ;;  %p1710_p2 = scmp.lt.u32.totalorder %s1708_s3, %s1703_s15 }
  0x80   : > { %p1712_p8 = scmp.lt.u32.totalorder %s1703_s15, %s2081_s14 }
  0x81   : > { %p1706_p12 = pnand %p1705_p9, %p1704_p7  ;;  %p1711_p4 = por %p1710_p2, %p1709_p1 }
  0x83   : > { %p1707_p0 = pneg %p1706_p12  ;;  %p1713_p13 = por %p1712_p8, %p1711_p4 }
  0x85   : > { %p1714_p6 = pnand %p1713_p13, %p1707_p0 }
  0x87   : > { %1717 = shalt.err (!%p1714_p6)
}
  0x88   : > { %s1718_s22 = scalar_lea.vmem %s2088_s30, 128  ;;  %s1848_s16 = smov [#allocation2]  }
  0x89   : > { %p1719_p10 = scmp.ne.s32.totalorder %s2088_s30, %s1718_s22  ;;  %s1723_s26 = sshll.u32 %s1848_s16, 4  ;;  %s1724_s26 = int_to_ptr.vmem [resolvable:$false] %s1723_s26 }
  0x8a   : > { %s1725_s5 = scalar_lea.vmem %s1724_s26, 256  ;;  %p1726_p12 = scmp.lt.s32.totalorder %s2088_s30, %s1724_s26 }
  0x8b   : > { %p1721_p3 = pnand %p1719_p10, %p1705_p9  ;;  %p1727_p1 = scmp.lt.s32.totalorder %s1725_s5, %s1718_s22 }
  0x8d   : > { %p1722_p7 = pneg %p1721_p3  ;;  %p1728_p2 = por %p1727_p1, %p1726_p12 }
  0x8f   : > { %p1729_p4 = pnand %p1728_p2, %p1722_p7 }
  0x91   : > { %1732 = shalt.err (!%p1729_p4)
}
  0x92   : > { %s2398_s3 = smov 4   ;;  %s2399_s7 = smov 64  }
  0x93   : > { %1526 = dma.hbm_to_vmem [thread:$0]  (!%p2084_p11), %s2081_s14, 128, %s2088_s30, %s2095_s12, %s2399_s7, %s2399_s7, %s2398_s3  }
  0x94   : > { %s400_s15 = scalar_lea.vmem [#allocation5], %s2076_s13  ;;  %s396_s10 = sand.u32 1, %s1841_s20  }
  0x95   : > { %s407_s28 = sshll.u32 %s400_s15, 4  ;;  %s2130_s27 = scalar_lea.sflag [#allocation6], %s396_s10  ;;  %s2128_s28 = int_to_ptr.vmem [resolvable:$true] %s407_s28 }
  0x96   : > { %s1733_s22 = scalar_lea.hbm %s2093_s29, 128  ;;  %s1738_s5 = scalar_lea.hbm %s2355_s1, 256 }
  0x97   : > { %p1734_p0 = scmp.ne.s32.totalorder %s2093_s29, %s1733_s22  ;;  %p1739_p6 = scmp.lt.u32.totalorder %s2093_s29, %s2355_s1 }
  0x98   : > { %p1740_p10 = scmp.lt.u32.totalorder %s1738_s5, %s1733_s22  ;;  %p1742_p7 = scmp.lt.u32.totalorder %s1733_s22, %s2093_s29 }
  0x99   : > { %p1736_p8 = pnand %p1734_p0, %p1705_p9 }
  0x9a   : > { %p1741_p3 = por %p1740_p10, %p1739_p6 }
  0x9b   : > { %p1737_p13 = pneg %p1736_p8 }
  0x9c   : > { %p1743_p12 = por %p1742_p7, %p1741_p3 }
  0x9e   : > { %p1744_p1 = pnand %p1743_p12, %p1737_p13 }
  0xa0   : > { %1747 = shalt.err (!%p1744_p1)
}
  0xa1   : > { %s1748_s13 = scalar_lea.vmem %s2128_s28, 128  ;;  %s1849_s14 = smov [#allocation5]  }
  0xa2   : > { %p1749_p2 = scmp.ne.s32.totalorder %s2128_s28, %s1748_s13  ;;  %s1753_s30 = sshll.u32 %s1849_s14, 4  ;;  %s1754_s30 = int_to_ptr.vmem [resolvable:$false] %s1753_s30 }
  0xa3   : > { %s1755_s0 = scalar_lea.vmem %s1754_s30, 256  ;;  %p1756_p8 = scmp.lt.s32.totalorder %s2128_s28, %s1754_s30 }
  0xa4   : > { %p1751_p4 = pnand %p1749_p2, %p1705_p9  ;;  %p1757_p6 = scmp.lt.s32.totalorder %s1755_s0, %s1748_s13 }
  0xa6   : > { %p1752_p0 = pneg %p1751_p4  ;;  %p1758_p10 = por %p1757_p6, %p1756_p8 }
  0xa8   : > { %p1759_p3 = pnand %p1758_p10, %p1752_p0 }
  0xaa   : > { %1762 = shalt.err (!%p1759_p3)
}
  0xab   : > { %1529 = dma.hbm_to_vmem [thread:$0]  (!%p2084_p11), %s2093_s29, 128, %s2128_s28, %s2130_s27, %s2399_s7, %s2399_s7, %s2398_s3  }
  0xac   : > { %p2400_p9 = scmp.ne.s32.totalorder %s2387_s25, 0 }
  0xad   : > { %s2162_s11 = sand.u32 (!%p2400_p9), 1, %s1833_s18   ;;  %p2401_p13 = scmp.ne.s32.totalorder (!%p2400_p9), %s2384_s23, 0 }
  0xae   : > { %427 = sbr.rel (%p2400_p9) target bundleno = 1594 (0x63a), region = 64  ;;  %s1297_s12 = sshll.u32 (!%p2400_p9), %s2162_s11, 3 }
  0xaf   : > { %s430_s15 = scalar_lea.sflag (!%p2400_p9), [#allocation3], %s2162_s11  ;;  %s2166_s10 = scalar_lea.vmem (!%p2400_p9), [#allocation2], %s1297_s12 }
  0xb5   : > { %1808 = dma.done.wait (%p2401_p13), %s430_s15, 128  }
  0xb6   : > { %1810 = vsyncadd (%p2401_p13), %s430_s15, 4294967168  ;;  %s438_s8 = sand.u32 1, %s1937_s21   ;;  %s2173_s29 = scalar_lea.vmem [#allocation5], %s1297_s12 }
  0xb7   : > { %s439_s25 = scalar_lea.sflag [#allocation6], %s438_s8 }
  0xb8   : > { %1812 = dma.done.wait (%p2401_p13), %s439_s25, 128  }
  0xb9   : > { %1814 = vsyncadd (%p2401_p13), %s439_s25, 4294967168  ;;  %p2402_p11 = scmp.eq.s32.totalorder %s1937_s21, 0 }
  0xbb   : > { %1816 = dma.done.wait (%p2402_p11), [#allocation6], 1024   ;;  %p2403_p7 = pmov %p2402_p11 }
  0xbd   : > { %1818 = vsyncadd (%p2403_p7), [#allocation6], 4294966272  ;;  %p2404_p12 = pmov %p2403_p7 }
  0xbe   : > { %p2405_p1 = pmov %p2403_p7 }
  0xbf   : > { %1820 = dma.done.wait (%p2404_p12), [#allocation9], 2048  }
  0xc0   : > { %1822 = vsyncadd (%p2405_p1), [#allocation9], 4294965248  ;;  %v1850_v0 = vmov 0.0   ;;  %vm1851_vm0 = vmmov 0   ;;  %v1585_v1 = vld [vmem:[#allocation7] sm:$0xff]   ;;  %v1586_v2 = vld [vmem:[#allocation7 + $0x8] sm:$0xff]  }
  0xc1   : > { %1397 = vmatprep.subr.bf16.mxu0 %v1850_v0  ;;  %1413 = vmatprep.mubr.msk.bf16.mxu0 %vm1851_vm0, %v1850_v0  ;;  %v1587_v3 = vld [vmem:[#allocation7 + $0x10] sm:$0xff]   ;;  %v1588_v4 = vld [vmem:[#allocation7 + $0x18] sm:$0xff]   ;;  %v1589_v5 = vld [vmem:[#allocation7 + $0x20] sm:$0xff]   ;;  %p503_p2 = scmp.lt.s32.totalorder %s1937_s21, 1  ;;  %v1852_v10 = vmov 0   ;;  %vm639_vm1 = vcmask 130048  }
  0xc2   : > { %1417 = vmatprep.subr.bf16.mxu1 %v1850_v0  ;;  %1419 = vmatprep.mubr.msk.bf16.mxu1 %vm1851_vm0, %v1850_v0  ;;  %v1590_v6 = vld [vmem:[#allocation7 + $0x28] sm:$0xff]   ;;  %v1591_v7 = vld [vmem:[#allocation7 + $0x30] sm:$0xff]   ;;  %v1592_v8 = vld [vmem:[#allocation7 + $0x38] sm:$0xff]   ;;  %s2406_s5 = sld [smem:[#allocation24_spill]]  ;;  %s1302_s13 = sshll.u32 %s2162_s11, 4 }
  0xc3   : > { %1398 = vmatpush3.bf16.msra.mxu0 %v1585_v1  ;;  %v2201_v9 = vld [vmem:[%s2166_s10] sm:$0xff]   ;;  %1584 = vset.pattern.permute.xlu0 %v1852_v10  ;;  %s504_s23 = scalar_select %p503_p2, %s1937_s21, 1  ;;  %v2213_v18 = vld [vmem:[%s2173_s29] sm:$0xff]  }
  0xc4   : > { %1399 = vmatprep.subr.bf16.mxu0 %v1850_v0  ;;  %v1595_v19 = vld [vmem:[#allocation8] sm:$0xff]   ;;  %v1596_v20 = vld [vmem:[#allocation8 + $0x8] sm:$0xff]   ;;  %v1597_v21 = vld [vmem:[#allocation8 + $0x10] sm:$0xff]   ;;  %s2407_s0 = sld [smem:[#allocation25_spill]]  ;;  %s502_s12 = scalar_lea.vmem [#allocation11], %s1302_s13 }
  0xc5   : > { %s1353_s3 = sshll.u32 %s504_s23, 4  ;;  %v1598_v22 = vld [vmem:[#allocation8 + $0x18] sm:$0xff]   ;;  %v1599_v23 = vld [vmem:[#allocation8 + $0x20] sm:$0xff]   ;;  %v1600_v24 = vld [vmem:[#allocation8 + $0x28] sm:$0xff]   ;;  %s1148_s15 = sshll.u32 %s502_s12, 4  ;;  %s2304_s15 = int_to_ptr.vmem [resolvable:$true] %s1148_s15 }
  0xc6   : > { %s507_s27 = scalar_lea.vmem %s2356_s2, %s1353_s3  ;;  %v1601_v25 = vld [vmem:[#allocation8 + $0x30] sm:$0xff]   ;;  %v1602_v26 = vld [vmem:[#allocation8 + $0x38] sm:$0xff]   ;;  %v1314_v27 = vld [vmem:[%s2358_s4] ss:$0 sm:$0xff]  ;;  %s1354_s10 = sshll.u32 %s1937_s21, 8 }
  0xc7   : > { %1400 = vmatpush3.bf16.msra.mxu0 %v1586_v2  ;;  %v513_v11 = vld [vmem:[%s507_s27] sm:$0xff]  ;;  %v514_v12 = vld [vmem:[%s507_s27 + $0x8] sm:$0xff]  ;;  %v1605_v48 = vld [vmem:[#allocation10 + $0x10] sm:$0xff]   ;;  %s2408_s29 = sld [smem:[#allocation26_spill]]  ;;  %s1135_s3 = scalar_lea.sflag [#allocation4], %s2162_s11 }
  0xc8   : > { %1401 = vmatprep.subr.bf16.mxu0 %v1850_v0  ;;  %688 = vperm.xlu0 %1584, %v513_v11   ;;  %v1603_v46 = vld [vmem:[#allocation10] sm:$0xff]   ;;  %v1604_v47 = vld [vmem:[#allocation10 + $0x8] sm:$0xff]   ;;  %v1606_v49 = vld [vmem:[#allocation10 + $0x18] sm:$0xff]   ;;  %s1763_s7 = scalar_lea.vmem %s2304_s15, 256  ;;  %s1853_s21 = smov [#allocation11]  }
  0xc9   : > { %v1607_v50 = vld [vmem:[#allocation10 + $0x20] sm:$0xff]   ;;  %v1608_v51 = vld [vmem:[#allocation10 + $0x28] sm:$0xff]   ;;  %v1609_v52 = vld [vmem:[#allocation10 + $0x30] sm:$0xff]   ;;  %p1764_p4 = scmp.ne.s32.totalorder %s2304_s15, %s1763_s7  ;;  %s1767_s28 = sshll.u32 %s1853_s21, 4  ;;  %s1768_s28 = int_to_ptr.vmem [resolvable:$false] %s1767_s28 }
  0xca   : > { %v1610_v53 = vld [vmem:[#allocation10 + $0x38] sm:$0xff]   ;;  %v1325_v54 = vld [vmem:[%s2360_s6] ss:$0 sm:$0xff]  ;;  %v1612_v10 = vld [vmem:[%s2363_s9 + $0x8] sm:$0xff]   ;;  %s1769_s27 = scalar_lea.vmem %s1768_s28, 512  ;;  %p1770_p6 = scmp.lt.s32.totalorder %s2304_s15, %s1768_s28 }
  0xcb   : > { %1402 = vmatpush3.bf16.msra.mxu0 %v1587_v3  ;;  %v1613_v11 = vld [vmem:[%s2363_s9 + $0x10] sm:$0xff]   ;;  %p1765_p0 = pnand %p1764_p4, %p2070_p5  ;;  %p1771_p10 = scmp.lt.s32.totalorder %s1769_s27, %s1763_s7 }
  0xcc   : > { %1403 = vmatprep.subr.bf16.mxu0 %v1850_v0  ;;  %693 = vperm.xlu0 %1584, %v514_v12   ;;  %v1614_v12 = vld [vmem:[%s2363_s9 + $0x18] sm:$0xff]  }
  0xcd   : > { %s2309_s23 = scalar_lea.hbm %s2408_s29, %s1354_s10  ;;  %p1766_p8 = pneg %p1765_p0 }
  0xce   : > { %p1772_p3 = por %p1771_p10, %p1770_p6 }
  0xcf   : > { %1404 = vmatpush3.bf16.msra.mxu0 %v1588_v4 }
  0xd0   : > { %1405 = vmatprep.subr.bf16.mxu0 %v1850_v0  ;;  %p1773_p9 = pnand %p1772_p3, %p1766_p8 }
  0xd3   : > { %1406 = vmatpush3.bf16.msra.mxu0 %v1589_v5 }
  0xd4   : > { %1407 = vmatprep.subr.bf16.mxu0 %v1850_v0 }
  0xd7   : > { %1408 = vmatpush3.bf16.msra.mxu0 %v1590_v6 }
  0xd8   : > { %1409 = vmatprep.subr.bf16.mxu0 %v1850_v0 }
  0xdb   : > { %1410 = vmatpush3.bf16.msra.mxu0 %v1591_v7 }
  0xdc   : > { %1411 = vmatprep.subr.bf16.mxu0 %v1850_v0 }
  0xdf   : > { %1412 = vmatpush3.bf16.msra.mxu0 %v1592_v8  ;;  %v1611_v8 = vld [vmem:[%s2363_s9] sm:$0xff]  }
  0xe0   : > { %1469 = vmatprep.subr.bf16.mxu0 %v1850_v0 }
  0xe2   : > { %1414 = vmatmul.mubr.bf16.vlgmr.msra.gmra.mrb[0].mxu0 %v2201_v9 }
  0xe3   : > { %1471 = vmatprep.mubr.msk.bf16.mxu0 %vm1851_vm0, %v1850_v0 }
 0x147   : > { %v2231_v28 = vpop.permute.xlu0 %688 }
 0x14b   : > { %v2233_v37 = vpop.permute.xlu0 %693 }
 0x1b5   : > { %v620_v13 = vpop.f32.mrb[0].mxu0 }
 0x1b6   : > { %v1415_v14 = vpop.f32.mrb[1].mxu0 }
 0x1b7   : > { %v623_v15 = vpop.f32.mrb[2].mxu0  ;;  %v1616_v14 = vld [vmem:[%s2363_s9 + $0x28] sm:$0xff]  }
 0x1b8   : > { %v627_v16 = vpack.c.bf16 %v623_v15, %v620_v13  ;;  %v1416_v17 = vpop.f32.mrb[3].mxu0  ;;  %v1615_v13 = vld [vmem:[%s2363_s9 + $0x20] sm:$0xff]   ;;  %v1617_v15 = vld [vmem:[%s2363_s9 + $0x30] sm:$0xff]  }
 0x1ba   : > { %1418 = vmatpush3.bf16.msra.mxu1 %v627_v16  ;;  %v1618_v16 = vld [vmem:[%s2363_s9 + $0x38] sm:$0xff]  }
 0x1bb   : > { %1423 = vmatprep.subr.bf16.mxu1 %v1850_v0 }
 0x1bd   : > { %1420 = vmatmul.mubr.msk.bf16.vlgmr.msra.gmra.mrb[0].mxu1 %vm639_vm1, %v2213_v18 }
 0x1be   : > { %1424 = vmatpush3.bf16.msra.mxu1 %v1595_v19  ;;  %1439 = vmatprep.mubr.msk.bf16.mxu1 %vm1851_vm0, %v1850_v0 }
 0x1bf   : > { %1425 = vmatprep.subr.bf16.mxu1 %v1850_v0 }
 0x1c2   : > { %1426 = vmatpush3.bf16.msra.mxu1 %v1596_v20 }
 0x1c3   : > { %1427 = vmatprep.subr.bf16.mxu1 %v1850_v0 }
 0x1c6   : > { %1428 = vmatpush3.bf16.msra.mxu1 %v1597_v21  ;;  %v1335_v21 = vld [vmem:[%s2406_s5] ss:$0 sm:$0xff] }
 0x1c7   : > { %1429 = vmatprep.subr.bf16.mxu1 %v1850_v0 }
 0x1ca   : > { %1430 = vmatpush3.bf16.msra.mxu1 %v1598_v22 }
 0x1cb   : > { %1431 = vmatprep.subr.bf16.mxu1 %v1850_v0 }
 0x1ce   : > { %1432 = vmatpush3.bf16.msra.mxu1 %v1599_v23 }
 0x1cf   : > { %1433 = vmatprep.subr.bf16.mxu1 %v1850_v0 }
 0x1d2   : > { %1434 = vmatpush3.bf16.msra.mxu1 %v1600_v24 }
 0x1d3   : > { %1435 = vmatprep.subr.bf16.mxu1 %v1850_v0 }
 0x1d6   : > { %1436 = vmatpush3.bf16.msra.mxu1 %v1601_v25 }
 0x1d7   : > { %1437 = vmatprep.subr.bf16.mxu1 %v1850_v0 }
 0x1da   : > { %1438 = vmatpush3.bf16.msra.mxu1 %v1602_v26 }
 0x1db   : > { %1443 = vmatprep.subr.bf16.mxu1 %v1850_v0 }
 0x290   : > { %v677_v29 = vpop.f32.mrb[0].mxu1 }
 0x291   : > { %v678_v30 = vadd.f32 %v1314_v27, %v677_v29  ;;  %v1421_v31 = vpop.f32.mrb[1].mxu1 }
 0x292   : > { %v680_v32 = vpop.f32.mrb[2].mxu1 }
 0x293   : > { %v684_v33 = vmax.f32 %v678_v30, 0.0  ;;  %v681_v34 = vadd.f32 %v1314_v27, %v680_v32  ;;  %v1422_v35 = vpop.f32.mrb[3].mxu1 }
 0x295   : > { %v685_v36 = vmax.f32 %v681_v34, 0.0  ;;  %v696_v38 = vmul.f32 %v2231_v28, %v684_v33 }
 0x297   : > { %v697_v39 = vmul.f32 %v2233_v37, %v685_v36 }
 0x299   : > { %v698_v40 = vpack.c.bf16 %v697_v39, %v696_v38 }
 0x29b   : > { %1440 = vmatmul.mubr.bf16.vlgmr.msra.gmra.mrb[4].mxu1 %v698_v40 }
 0x29c   : > { %1445 = vmatprep.mubr.msk.bf16.mxu1 %vm1851_vm0, %v1850_v0 }
 0x36e   : > { %v798_v41 = vpop.f32.mrb[4].mxu1 }
 0x36f   : > { %v1441_v42 = vpop.f32.mrb[5].mxu1 }
 0x370   : > { %v801_v43 = vpop.f32.mrb[6].mxu1 }
 0x371   : > { %v805_v44 = vpack.c.bf16 %v801_v43, %v798_v41  ;;  %v1442_v45 = vpop.f32.mrb[7].mxu1 }
 0x373   : > { %1444 = vmatpush3.bf16.msra.mxu1 %v805_v44 }
 0x374   : > { %1449 = vmatprep.subr.bf16.mxu1 %v1850_v0 }
 0x376   : > { %1446 = vmatmul.mubr.msk.bf16.vlgmr.msra.gmra.mrb[8].mxu1 %vm639_vm1, %v2213_v18 }
 0x377   : > { %1450 = vmatpush3.bf16.msra.mxu1 %v1603_v46  ;;  %1465 = vmatprep.mubr.msk.bf16.mxu1 %vm1851_vm0, %v1850_v0 }
 0x378   : > { %1451 = vmatprep.subr.bf16.mxu1 %v1850_v0 }
 0x37b   : > { %1452 = vmatpush3.bf16.msra.mxu1 %v1604_v47 }
 0x37c   : > { %1453 = vmatprep.subr.bf16.mxu1 %v1850_v0 }
 0x37f   : > { %1454 = vmatpush3.bf16.msra.mxu1 %v1605_v48 }
 0x380   : > { %1455 = vmatprep.subr.bf16.mxu1 %v1850_v0 }
 0x383   : > { %1456 = vmatpush3.bf16.msra.mxu1 %v1606_v49 }
 0x384   : > { %1457 = vmatprep.subr.bf16.mxu1 %v1850_v0 }
 0x387   : > { %1458 = vmatpush3.bf16.msra.mxu1 %v1607_v50 }
 0x388   : > { %1459 = vmatprep.subr.bf16.mxu1 %v1850_v0 }
 0x38b   : > { %1460 = vmatpush3.bf16.msra.mxu1 %v1608_v51 }
 0x38c   : > { %1461 = vmatprep.subr.bf16.mxu1 %v1850_v0 }
 0x38f   : > { %1462 = vmatpush3.bf16.msra.mxu1 %v1609_v52 }
 0x390   : > { %1463 = vmatprep.subr.bf16.mxu1 %v1850_v0 }
 0x393   : > { %1464 = vmatpush3.bf16.msra.mxu1 %v1610_v53 }
 0x449   : > { %v846_v55 = vpop.f32.mrb[8].mxu1 }
 0x44a   : > { %v847_v56 = vadd.f32 %v1325_v54, %v846_v55  ;;  %v1447_v57 = vpop.f32.mrb[9].mxu1 }
 0x44b   : > { %v849_v58 = vpop.f32.mrb[10].mxu1 }
 0x44c   : > { %v853_v59 = vmax.f32 %v847_v56, 0.0  ;;  %v850_v60 = vadd.f32 %v1325_v54, %v849_v58  ;;  %v1448_v61 = vpop.f32.mrb[11].mxu1 }
 0x44e   : > { %v854_v62 = vmax.f32 %v850_v60, 0.0  ;;  %v855_v63 = vmul.f32 %v853_v59, %v2231_v28 }
 0x450   : > { %v856_v1 = vmul.f32 %v854_v62, %v2233_v37 }
 0x452   : > { %v857_v2 = vpack.c.bf16 %v856_v1, %v855_v63 }
 0x454   : > { %1466 = vmatmul.mubr.bf16.vlgmr.msra.gmra.mrb[12].mxu1 %v857_v2 }
 0x527   : > { %v957_v3 = vpop.f32.mrb[12].mxu1 }
 0x528   : > { %v1467_v4 = vpop.f32.mrb[13].mxu1 }
 0x529   : > { %v960_v5 = vpop.f32.mrb[14].mxu1 }
 0x52a   : > { %v964_v6 = vpack.c.bf16 %v960_v5, %v957_v3  ;;  %v1468_v7 = vpop.f32.mrb[15].mxu1 }
 0x52c   : > { %1470 = vmatpush3.bf16.msra.mxu0 %v964_v6 }
 0x52d   : > { %1475 = vmatprep.subr.bf16.mxu0 %v1850_v0 }
 0x52f   : > { %1472 = vmatmul.mubr.msk.bf16.vlgmr.msra.gmra.mrb[4].mxu0 %vm639_vm1, %v2213_v18 }
 0x530   : > { %1476 = vmatpush3.bf16.msra.mxu0 %v1611_v8  ;;  %1491 = vmatprep.mubr.msk.bf16.mxu0 %vm1851_vm0, %v1850_v0 }
 0x531   : > { %1477 = vmatprep.subr.bf16.mxu0 %v1850_v0 }
 0x534   : > { %1478 = vmatpush3.bf16.msra.mxu0 %v1612_v10 }
 0x535   : > { %1479 = vmatprep.subr.bf16.mxu0 %v1850_v0 }
 0x538   : > { %1480 = vmatpush3.bf16.msra.mxu0 %v1613_v11 }
 0x539   : > { %1481 = vmatprep.subr.bf16.mxu0 %v1850_v0 }
 0x53c   : > { %1482 = vmatpush3.bf16.msra.mxu0 %v1614_v12 }
 0x53d   : > { %1483 = vmatprep.subr.bf16.mxu0 %v1850_v0 }
 0x540   : > { %1484 = vmatpush3.bf16.msra.mxu0 %v1615_v13 }
 0x541   : > { %1485 = vmatprep.subr.bf16.mxu0 %v1850_v0 }
 0x544   : > { %1486 = vmatpush3.bf16.msra.mxu0 %v1616_v14 }
 0x545   : > { %1487 = vmatprep.subr.bf16.mxu0 %v1850_v0 }
 0x548   : > { %1488 = vmatpush3.bf16.msra.mxu0 %v1617_v15 }
 0x549   : > { %1489 = vmatprep.subr.bf16.mxu0 %v1850_v0  ;;  %v1337_v0 = vld [vmem:[%s2407_s0] ss:$0 sm:$0xff] }
 0x54c   : > { %1490 = vmatpush3.bf16.msra.mxu0 %v1618_v16 }
 0x54f   : > { %1492 = vmatmul.mubr.bf16.vlgmr.msra.gmra.mrb[8].mxu0 %v2201_v9 }
 0x602   : > { %v1005_v17 = vpop.f32.mrb[4].mxu0 }
 0x603   : > { %v1473_v18 = vpop.f32.mrb[5].mxu0  ;;  %v1006_v22 = vadd.f32 %v1335_v21, %v1005_v17 }
 0x604   : > { %v1008_v19 = vpop.f32.mrb[6].mxu0 }
 0x605   : > { %v1474_v20 = vpop.f32.mrb[7].mxu0  ;;  %v1009_v23 = vadd.f32 %v1335_v21, %v1008_v19  ;;  %v1012_v24 = vmax.f32 %v1006_v22, 0.0 }
 0x607   : > { %v1013_v25 = vmax.f32 %v1009_v23, 0.0  ;;  %v1014_v9 = vmul.f32 %v1012_v24, %v2231_v28 }
 0x609   : > { %v1015_v31 = vmul.f32 %v1013_v25, %v2233_v37 }
 0x622   : > { %v1121_v26 = vpop.f32.mrb[8].mxu0 }
 0x623   : > { %v1122_v27 = vadd.f32 %v1337_v0, %v1121_v26  ;;  %v1493_v29 = vpop.f32.mrb[9].mxu0 }
 0x624   : > { %v1124_v30 = vpop.f32.mrb[10].mxu0 }
 0x625   : > { %v1128_v32 = vadd.f32 %v1122_v27, %v1014_v9  ;;  %v1125_v33 = vadd.f32 %v1337_v0, %v1124_v30  ;;  %v1494_v34 = vpop.f32.mrb[11].mxu0 }
 0x627   : > { %v1130_v35 = vmul.f32 %v1128_v32, %v2231_v28  ;;  %v1129_v36 = vadd.f32 %v1125_v33, %v1015_v31 }
 0x629   : > { %1132 = vst [vmem:[%s502_s12] sm:$0xff] %v1130_v35  ;;  %v1131_v38 = vmul.f32 %v1129_v36, %v2233_v37 }
 0x62b   : > { %1133 = vst [vmem:[%s502_s12 + $0x8] sm:$0xff] %v1131_v38 }
 0x62c   : > { %1776 = shalt.err (!%p1773_p9)
}
 0x62d   : > { %s1777_s22 = scalar_lea.hbm %s2309_s23, 256  ;;  %s1781_s5 = scalar_lea.hbm %s2408_s29, 512 }
 0x62e   : > { %p1778_p13 = scmp.ne.s32.totalorder %s2309_s23, %s1777_s22  ;;  %p1782_p12 = scmp.lt.u32.totalorder %s2309_s23, %s2408_s29 }
 0x62f   : > { %p1783_p1 = scmp.lt.u32.totalorder %s1781_s5, %s1777_s22  ;;  %p1785_p4 = scmp.lt.u32.totalorder %s1777_s22, %s2309_s23 }
 0x630   : > { %p1779_p11 = pnand %p1778_p13, %p2070_p5 }
 0x631   : > { %p1784_p2 = por %p1783_p1, %p1782_p12 }
 0x632   : > { %p1780_p7 = pneg %p1779_p11 }
 0x633   : > { %p1786_p0 = por %p1785_p4, %p1784_p2 }
 0x635   : > { %p1787_p8 = pnand %p1786_p0, %p1780_p7 }
 0x637   : > { %1790 = shalt.err (!%p1787_p8)
}
 0x638   : > { %s1854_s30 = smov 128   ;;  %s1855_s0 = smov 8  }
 0x639   : > { %1511 = dma.vmem_to_hbm [thread:$0]  (%p2070_p5), %s2304_s15, 256, %s2309_s23, %s1135_s3, %s1854_s30, %s1854_s30, %s1855_s0  }
 0x63a PF: > { %s2409_s12 = sld [smem:[#allocation17_spill]]  ;;  %s2410_s10 = sld [smem:[#allocation18_spill]] }
 0x63b   : > { %p2412_p10 = scmp.ge.s32.totalorder %s1841_s20, 2 }
 0x640   : > { %s1163_s8 = sand.u32 1, %s2409_s12   ;;  %p2411_p6 = scmp.ne.s32.totalorder %s2410_s10, 0 }
 0x641   : > { %s1164_s25 = scalar_lea.sflag [#allocation4], %s1163_s8 }
 0x642   : > { %p1531_p3 = pnand %p2412_p10, %p2411_p6 }
 0x644   : > { %1824 = dma.done.wait (!%p1531_p3), %s1164_s25, 256  }
 0x645   : > { %1826 = vsyncadd (!%p1531_p3), %s1164_s25, 4294967040  ;;  %s2413_s7 = sld [smem:[#allocation19_spill]]  ;;  %p28_p9 = scmp.ge.s32.totalorder %s2056_s24, 4  }
 0x646   : > { %s2414_s17 = smov %s1833_s18  ;;  %s2415_s18 = smov %s1837_s19 }
 0x647   : > { %s2417_s20 = smov %s2056_s24  ;;  %30 = sbr.rel (!%p28_p9) target bundleno = 16 (0x10), region = 137 }
 0x64b   : > { %s2416_s19 = smov %s2413_s7 }
 0x64e   :  { %1169 = vsyncpa [#allocation3], 1 }
 0x64f   :  { %1171 = vsyncpa [#allocation3 + $0x1], 1 }
 0x650   :  { %1172 = vsyncpa [#allocation6], 1 }
 0x651   :  { %1174 = vsyncpa [#allocation6 + $0x1], 1 }
 0x652   :  { %1175 = vsyncpa [#allocation9], 1 }
 0x653   :  { %1176 = vsyncpa [#allocation4], 1 }
 0x654   :  { %1178 = vsyncpa [#allocation4 + $0x1], 1 }

</bundles_post_ra>
